<compile_context>
chip_gen: v5e
topology: v5e:2x2
jax: 0.10.0
libtpu: 0.0.40
codegen_flags: <defaults>
</compile_context>

<pallas_src>
import functools

import numpy as np
import jax
import jax.numpy as jnp
from jax import lax
from jax.experimental import pallas as pl
from jax.experimental.pallas import tpu as pltpu


# ----------------------------------------------------------------------------
# Positional encoding (exact reproduction of the PyTorch helper).
# ----------------------------------------------------------------------------
def positional_encoding(seq_len: int, embedding_dim: int) -> jnp.ndarray:
    pe = np.zeros([seq_len, embedding_dim])
    for pos in range(seq_len):
        for i in range(0, embedding_dim, 2):
            pe[pos, i] = np.sin(pos / 10000.0 ** (2 * i / embedding_dim))
            pe[pos, i + 1] = np.cos(pos / 10000.0 ** (2 * (i + 1) / embedding_dim))
    return jnp.asarray(pe, jnp.float32)


def _layer_norm(x, gamma, beta, eps=1e-5):
    mu = jnp.mean(x, axis=-1, keepdims=True)
    xc = x - mu
    var = jnp.mean(xc * xc, axis=-1, keepdims=True)
    return xc * lax.rsqrt(var + eps) * gamma + beta


# ----------------------------------------------------------------------------
# Fused encoder-layer kernel (QKV proj -> per-head attention -> out proj ->
# residual+LN -> FFN -> residual+LN), one grid step per block of batch rows.
# ----------------------------------------------------------------------------
def _encoder_layer_kernel(pm_ref, x_ref,
                          wqkv_ref, bqkv_ref, wo_ref, bo_ref,
                          g1_ref, be1_ref,
                          w1_ref, b1_ref, w2_ref, b2_ref,
                          g2_ref, be2_ref,
                          o_ref, *, num_heads: int, head_dim: int):
    Bt, S, E = x_ref.shape
    HD = num_heads * head_dim
    mxu = jnp.bfloat16                      # MXU operand dtype (f32 accumulate)

    x = x_ref[...]                          # (Bt, S, E) f32
    x2 = x.reshape(Bt * S, E)               # flatten batch*seq -> big M for the MXU

    # --- fused QKV projection for all heads: (Bt*S, E) @ (E, 3*HD), bf16 MXU ---
    qkv = jnp.dot(x2.astype(mxu), wqkv_ref[...],
                  preferred_element_type=jnp.float32) + bqkv_ref[...]

    # additive pad-mask bias, computed once and reused by every head.
    mask_bias = jnp.where(pm_ref[...] != 0, jnp.float32(-1e9), jnp.float32(0.0))

    inv_scale = 1.0 / float(head_dim) ** 0.5          # folded into Q (O(S*D))
    wo = wo_ref[...]                                  # (HD, E) bf16

    # --- per-head attention, heads unrolled (short static count). Each head's
    #     context is accumulated directly through its slab of Wo, so there is no
    #     concatenate and no list of live head outputs.
    y = jnp.zeros((Bt * S, E), jnp.float32)
    for h in range(num_heads):
        q0 = h * head_dim
        k0 = HD + h * head_dim
        v0 = 2 * HD + h * head_dim
        qh = (qkv[:, q0:q0 + head_dim] * inv_scale).reshape(Bt, S, head_dim).astype(mxu)
        kh = qkv[:, k0:k0 + head_dim].reshape(Bt, S, head_dim).astype(mxu)
        vh = qkv[:, v0:v0 + head_dim].reshape(Bt, S, head_dim).astype(mxu)

        # scores: contract last dims directly — no transpose materialized.
        s = jnp.einsum('bqd,bkd->bqk', qh, kh,
                       preferred_element_type=jnp.float32) + mask_bias   # (Bt,S,S)

        m = jnp.max(s, axis=-1, keepdims=True)
        p = jnp.exp(s - m)
        p = p * pl.reciprocal(jnp.sum(p, axis=-1, keepdims=True), approx=True)

        ctx = jnp.einsum('bqk,bkd->bqd', p.astype(mxu), vh,
                         preferred_element_type=jnp.float32)             # (Bt,S,Dh)
        y = y + jnp.dot(ctx.reshape(Bt * S, head_dim).astype(mxu),
                        wo[h * head_dim:(h + 1) * head_dim, :],
                        preferred_element_type=jnp.float32)

    # --- output-projection bias + residual + LayerNorm (f32 elementwise) ---
    y = _layer_norm(y + bo_ref[...] + x2, g1_ref[...], be1_ref[...])

    # --- feed-forward + residual + LayerNorm ---
    h1 = jnp.maximum(
        jnp.dot(y.astype(mxu), w1_ref[...],
                preferred_element_type=jnp.float32) + b1_ref[...], 0.0)
    h2 = jnp.dot(h1.astype(mxu), w2_ref[...],
                 preferred_element_type=jnp.float32) + b2_ref[...]
    z = _layer_norm(y + h2, g2_ref[...], be2_ref[...])

    o_ref[...] = z.reshape(Bt, S, E).astype(o_ref.dtype)


# ----------------------------------------------------------------------------
# Generation-aware VMEM budgeting.
# ----------------------------------------------------------------------------
def _vmem_capacity_bytes():
    try:
        return int(pltpu.get_tpu_info().vmem_capacity_bytes)   # 64 MiB v7x, 128 MiB v5e/v6e
    except Exception:
        return 64 << 20        # conservative default (v7x per-TensorCore VMEM)


def _pick_batch_block(B, S, E, HD, hidden):
    """Largest batch block whose working set fits real VMEM, with >=2 grid steps."""
    vmem_cap = _vmem_capacity_bytes()
    budget = int(vmem_cap * 0.70)                         # headroom for compiler scratch

    # Resident weights (bf16 matmul slabs + f32 bias/LN), worst-case double-buffered
    # (pl.Buffered(1) single-buffering halves this when supported).
    weight_bytes = (2 * (E * 3 * HD + HD * E + E * hidden + hidden * E)
                    + 4 * (3 * HD + hidden + 6 * E))
    act_budget = max(budget - 2 * weight_bytes, 1 << 20)

    # f32 per-batch-row working set of one grid step: x/out (double-buffered),
    # fused qkv, FFN hidden, one head's (S,S) scores/probs (+exp temp), temps.
    per_row = 4 * S * (2 * 2 * E + 3 * HD + hidden + 3 * S + 3 * E)
    bt = max(1, min(B, act_budget // max(per_row, 1)))
    while B % bt:
        bt -= 1
    # keep at least 2 grid steps so both v7x TensorCores get work and the pipeline
    # has something to overlap.
    while bt > 1 and B // bt < 2:
        bt -= 1
        while B % bt:
            bt -= 1

    vmem_limit = max(32 << 20, int(vmem_cap * 0.80))      # ~51 MiB v7x, ~102 MiB v6e/v5e
    return bt, vmem_limit


# ----------------------------------------------------------------------------
# pallas_call wrapper.
# ----------------------------------------------------------------------------
def _make_layer_call(B, S, E, HD, hidden, *, num_heads, bt, vmem_limit,
                     single_buffer_weights):
    kernel = functools.partial(_encoder_layer_kernel,
                               num_heads=num_heads, head_dim=HD // num_heads)
    shared = lambda b: (0, 0)
    if single_buffer_weights:
        # grid-invariant blocks: one VMEM buffer instead of the default two.
        wspec = lambda shape: pl.BlockSpec(shape, shared, pipeline_mode=pl.Buffered(1))
    else:
        wspec = lambda shape: pl.BlockSpec(shape, shared)

    return pl.pallas_call(
        kernel,
        out_shape=jax.ShapeDtypeStruct((B, S, E), jnp.float32),
        grid_spec=pltpu.PrefetchScalarGridSpec(
            num_scalar_prefetch=0,
            grid=(B // bt,),
            in_specs=[
                pl.BlockSpec((bt, 1, S), lambda b: (b, 0, 0)),   # pad mask
                pl.BlockSpec((bt, S, E), lambda b: (b, 0, 0)),   # x
                wspec((E, 3 * HD)),       # fused [Wq|Wk|Wv]^T (bf16)
                wspec((1, 3 * HD)),       # fused biases       (f32)
                wspec((HD, E)),           # Wo^T               (bf16)
                wspec((1, E)),            # bo
                wspec((1, E)),            # ln1 gamma
                wspec((1, E)),            # ln1 beta
                wspec((E, hidden)),       # W1^T               (bf16)
                wspec((1, hidden)),       # b1
                wspec((hidden, E)),       # W2^T               (bf16)
                wspec((1, E)),            # b2
                wspec((1, E)),            # ln2 gamma
                wspec((1, E)),            # ln2 beta
            ],
            out_specs=pl.BlockSpec((bt, S, E), lambda b: (b, 0, 0)),
        ),
        compiler_params=pltpu.CompilerParams(
            dimension_semantics=("parallel",),      # batch blocks are independent
            vmem_limit_bytes=vmem_limit,
        ),
    )


def _layer_args(pm, x, lp, mxu_dtype=jnp.bfloat16):
    c = lambda a: a.astype(mxu_dtype)                 # pre-cast big slabs once
    return (pm, x,
            c(lp["w_qkv"]), lp["b_qkv"], c(lp["w_o"]), lp["b_o"],
            lp["g1"], lp["be1"],
            c(lp["w1"]), lp["b1"], c(lp["w2"]), lp["b2"],
            lp["g2"], lp["be2"])


def transformer_encoder_pallas(x, pad_mask, layer_params, *, num_heads):
    B, S, E = x.shape
    x = x + positional_encoding(S, E)[None]
    pm = pad_mask.astype(jnp.int32).reshape(B, 1, S)
    HD = layer_params[0]["w_qkv"].shape[1] // 3
    hidden = layer_params[0]["w1"].shape[1]
    bt, vmem_limit = _pick_batch_block(B, S, E, HD, hidden)

    def run(layer_fn):
        y = x
        for lp in layer_params:
            y = layer_fn(*_layer_args(pm, y, lp))
        return y

    try:
        fn = _make_layer_call(B, S, E, HD, hidden, num_heads=num_heads, bt=bt,
                              vmem_limit=vmem_limit, single_buffer_weights=True)
        return jax.block_until_ready(run(fn))
    except Exception:
        # This JAX build rejects pipeline_mode on pallas_call BlockSpecs; fall back
        # to the default double-buffered weight blocks.
        fn = _make_layer_call(B, S, E, HD, hidden, num_heads=num_heads, bt=bt,
                              vmem_limit=vmem_limit, single_buffer_weights=False)
        return run(fn)


# ----------------------------------------------------------------------------
# Pure-JAX reference (reproduces the PyTorch forward, eval mode).  `mxu_dtype`
# selects the matmul-operand precision so the kernel (bf16 MXU inputs, f32
# accumulate) can be checked tightly against an identically-cast reference.
# ----------------------------------------------------------------------------
def transformer_encoder_ref(x, pad_mask, layer_params, *, num_heads,
                            mxu_dtype=jnp.float32):
    B, S, E = x.shape
    c = lambda a: a.astype(mxu_dtype)
    x = x + positional_encoding(S, E)[None]
    for lp in layer_params:
        HD = lp["w_qkv"].shape[1] // 3
        hd = HD // num_heads
        inv = 1.0 / (hd ** 0.5)
        qkv = jnp.dot(c(x), c(lp["w_qkv"]),
                      preferred_element_type=jnp.float32) + lp["b_qkv"]
        q, k, v = qkv[..., :HD], qkv[..., HD:2 * HD], qkv[..., 2 * HD:]
        outs = []
        for h in range(num_heads):
            lo, hi = h * hd, (h + 1) * hd
            s = jnp.einsum('bqd,bkd->bqk', c(q[..., lo:hi] * inv), c(k[..., lo:hi]),
                           preferred_element_type=jnp.float32)
            s = jnp.where(pad_mask[:, None, :], -1e9, s)
            p = jax.nn.softmax(s, axis=-1)
            outs.append(jnp.einsum('bqk,bkd->bqd', c(p), c(v[..., lo:hi]),
                                   preferred_element_type=jnp.float32))
        attn = jnp.concatenate(outs, axis=-1)
        y = jnp.dot(c(attn), c(lp["w_o"]),
                    preferred_element_type=jnp.float32) + lp["b_o"]
        y = _layer_norm(x + y, lp["g1"], lp["be1"])
        h1 = jax.nn.relu(jnp.dot(c(y), c(lp["w1"]),
                                 preferred_element_type=jnp.float32) + lp["b1"])
        h2 = jnp.dot(c(h1), c(lp["w2"]),
                     preferred_element_type=jnp.float32) + lp["b2"]
        x = _layer_norm(y + h2, lp["g2"], lp["be2"])
    return x


# ----------------------------------------------------------------------------
# Parameter init (nn.Linear-style uniform +-1/sqrt(fan_in); weights pre-transposed).
# Per-layer QKV weights of all heads are concatenated: columns [0:HD]=Q (head-major),
# [HD:2HD]=K, [2HD:3HD]=V, so the kernel runs one wide (E, 3*HD) matmul.
# ----------------------------------------------------------------------------
def init_encoder_params(key, num_layers, embedding_dim, num_heads, hidden_dim):
    E = embedding_dim
    head_dim = E // num_heads
    HD = num_heads * head_dim

    def u(k, shape, fan_in):
        b = 1.0 / (fan_in ** 0.5)
        return jax.random.uniform(k, shape, jnp.float32, -b, b)

    layers = []
    for lk in jax.random.split(key, num_layers):
        ks = jax.random.split(lk, 12)
        layers.append(dict(
            w_qkv=u(ks[0], (E, 3 * HD), E),
            b_qkv=u(ks[1], (1, 3 * HD), E),
            w_o=u(ks[2], (HD, E), HD),
            b_o=u(ks[3], (1, E), HD),
            g1=1.0 + 0.1 * u(ks[4], (1, E), 1.0),
            be1=0.1 * u(ks[5], (1, E), 1.0),
            w1=u(ks[6], (E, hidden_dim), E),
            b1=u(ks[7], (1, hidden_dim), E),
            w2=u(ks[8], (hidden_dim, E), hidden_dim),
            b2=u(ks[9], (1, E), hidden_dim),
            g2=1.0 + 0.1 * u(ks[10], (1, E), 1.0),
            be2=0.1 * u(ks[11], (1, E), 1.0),
        ))
    return layers


if __name__ == "__main__":
    # TODO(synk): production configs should keep E, 3*HD and hidden multiples of 128
    # (lane-dense MXU tiles / unmasked stores); toy dims follow the module's scale.
    B, S, E = 2, 8, 32
    num_heads, hidden_dim, num_layers = 4, 64, 2

    root = jax.random.PRNGKey(0)
    kp, kx = jax.random.split(root, 2)
    params = init_encoder_params(kp, num_layers, E, num_heads, hidden_dim)

    x = jax.random.normal(kx, (B, S, E), jnp.float32)
    # pad_mask: True where the token is padding (last 2 tokens of batch 1 padded)
    pad_mask = jnp.array(
        [[False] * S,
         [False] * (S - 2) + [True, True]], dtype=jnp.bool_)

    out = jax.block_until_ready(
        transformer_encoder_pallas(x, pad_mask, params, num_heads=num_heads))

    # Tight check vs an identically-cast (bf16-MXU) reference; loose sanity check
    # vs the full-f32 reference (bf16 operands are a precision tradeoff, per review).
    ref_mxu = transformer_encoder_ref(x, pad_mask, params, num_heads=num_heads,
                                      mxu_dtype=jnp.bfloat16)
    ref_f32 = transformer_encoder_ref(x, pad_mask, params, num_heads=num_heads,
                                      mxu_dtype=jnp.float32)

    ok = (bool(jnp.allclose(out, ref_mxu, atol=5e-3, rtol=5e-3))
          and bool(jnp.allclose(out, ref_f32, atol=1e-1, rtol=1e-1)))
    if ok:
        print("KERNEL_OK")
    else:
        print("KERNEL_MISMATCH",
              float(jnp.max(jnp.abs(out - ref_mxu))),
              float(jnp.max(jnp.abs(out - ref_f32))))
</pallas_src>

<mosaic_0001>
module attributes {stable_mosaic.version = 11 : i64} {
  func.func @_encoder_layer_kernel(%arg0: i32, %arg1: memref<1x1x8xi32, #tpu.memory_space<vmem>>, %arg2: memref<1x8x32xf32, #tpu.memory_space<vmem>>, %arg3: memref<32x96xbf16, #tpu.memory_space<vmem>>, %arg4: memref<1x96xf32, #tpu.memory_space<vmem>>, %arg5: memref<32x32xbf16, #tpu.memory_space<vmem>>, %arg6: memref<1x32xf32, #tpu.memory_space<vmem>>, %arg7: memref<1x32xf32, #tpu.memory_space<vmem>>, %arg8: memref<1x32xf32, #tpu.memory_space<vmem>>, %arg9: memref<32x64xbf16, #tpu.memory_space<vmem>>, %arg10: memref<1x64xf32, #tpu.memory_space<vmem>>, %arg11: memref<64x32xbf16, #tpu.memory_space<vmem>>, %arg12: memref<1x32xf32, #tpu.memory_space<vmem>>, %arg13: memref<1x32xf32, #tpu.memory_space<vmem>>, %arg14: memref<1x32xf32, #tpu.memory_space<vmem>>, %arg15: memref<1x8x32xf32, #tpu.memory_space<vmem>>) attributes {dimension_semantics = [#tpu.dimension_semantics<parallel>], iteration_bounds = array<i64: 2>, scalar_prefetch = 0 : i64, scratch_operands = 0 : i64, tpu.core_type = #tpu.core_type<tc>, window_params = [{transform_indices = @transform_0, window_bounds = array<i64: 1, 1, 8>}, {transform_indices = @transform_1, window_bounds = array<i64: 1, 8, 32>}, {pipeline_mode = #tpu.pipeline_mode<synchronous>, transform_indices = @transform_2, window_bounds = array<i64: 32, 96>}, {pipeline_mode = #tpu.pipeline_mode<synchronous>, transform_indices = @transform_3, window_bounds = array<i64: 1, 96>}, {pipeline_mode = #tpu.pipeline_mode<synchronous>, transform_indices = @transform_4, window_bounds = array<i64: 32, 32>}, {pipeline_mode = #tpu.pipeline_mode<synchronous>, transform_indices = @transform_5, window_bounds = array<i64: 1, 32>}, {pipeline_mode = #tpu.pipeline_mode<synchronous>, transform_indices = @transform_6, window_bounds = array<i64: 1, 32>}, {pipeline_mode = #tpu.pipeline_mode<synchronous>, transform_indices = @transform_7, window_bounds = array<i64: 1, 32>}, {pipeline_mode = #tpu.pipeline_mode<synchronous>, transform_indices = @transform_8, window_bounds = array<i64: 32, 64>}, {pipeline_mode = #tpu.pipeline_mode<synchronous>, transform_indices = @transform_9, window_bounds = array<i64: 1, 64>}, {pipeline_mode = #tpu.pipeline_mode<synchronous>, transform_indices = @transform_10, window_bounds = array<i64: 64, 32>}, {pipeline_mode = #tpu.pipeline_mode<synchronous>, transform_indices = @transform_11, window_bounds = array<i64: 1, 32>}, {pipeline_mode = #tpu.pipeline_mode<synchronous>, transform_indices = @transform_12, window_bounds = array<i64: 1, 32>}, {pipeline_mode = #tpu.pipeline_mode<synchronous>, transform_indices = @transform_13, window_bounds = array<i64: 1, 32>}, {transform_indices = @transform_14, window_bounds = array<i64: 1, 8, 32>}]} {
    %c0 = arith.constant 0 : index
    %c0_0 = arith.constant 0 : index
    %c0_1 = arith.constant 0 : index
    %0 = vector.load %arg2[%c0, %c0_0, %c0_1] : memref<1x8x32xf32, #tpu.memory_space<vmem>>, vector<1x8x32xf32>
    %1 = vector.shape_cast %0 : vector<1x8x32xf32> to vector<8x32xf32>
    %2 = arith.truncf %1 : vector<8x32xf32> to vector<8x32xbf16>
    %c0_2 = arith.constant 0 : index
    %c0_3 = arith.constant 0 : index
    %3 = vector.load %arg3[%c0_2, %c0_3] : memref<32x96xbf16, #tpu.memory_space<vmem>>, vector<32x96xbf16>
    %cst = arith.constant dense<0.000000e+00> : vector<8x96xf32>
    %4 = tpu.matmul %2, %3, %cst {dimension_numbers = #tpu.dot_dimension_numbers<[1], [0], [0], [1], [0, 0, 1, 1], [], []>} : vector<8x32xbf16>, vector<32x96xbf16>, vector<8x96xf32> -> vector<8x96xf32>
    %c0_4 = arith.constant 0 : index
    %c0_5 = arith.constant 0 : index
    %5 = vector.load %arg4[%c0_4, %c0_5] : memref<1x96xf32, #tpu.memory_space<vmem>>, vector<1x96xf32>
    %6 = vector.broadcast %5 : vector<1x96xf32> to vector<8x96xf32>
    %7 = arith.addf %4, %6 : vector<8x96xf32>
    %c0_6 = arith.constant 0 : index
    %c0_7 = arith.constant 0 : index
    %c0_8 = arith.constant 0 : index
    %8 = vector.load %arg1[%c0_6, %c0_7, %c0_8] : memref<1x1x8xi32, #tpu.memory_space<vmem>>, vector<1x1x8xi32>
    %c0_i32 = arith.constant 0 : i32
    %9 = vector.broadcast %c0_i32 : i32 to vector<1x1x8xi32>
    %10 = arith.cmpi ne, %8, %9 : vector<1x1x8xi32>
    %cst_9 = arith.constant -1.000000e+09 : f32
    %cst_10 = arith.constant 0.000000e+00 : f32
    %11 = vector.broadcast %cst_9 : f32 to vector<1x1x8xf32>
    %12 = vector.broadcast %cst_10 : f32 to vector<1x1x8xf32>
    %13 = arith.select %10, %11, %12 : vector<1x1x8xi1>, vector<1x1x8xf32>
    %c0_11 = arith.constant 0 : index
    %c0_12 = arith.constant 0 : index
    %14 = vector.load %arg5[%c0_11, %c0_12] : memref<32x32xbf16, #tpu.memory_space<vmem>>, vector<32x32xbf16>
    %cst_13 = arith.constant 0.000000e+00 : f32
    %15 = vector.broadcast %cst_13 : f32 to vector<8x32xf32>
    %16 = vector.extract_strided_slice %7 {offsets = [0, 0], sizes = [8, 8], strides = [1, 1]} : vector<8x96xf32> to vector<8x8xf32>
    %cst_14 = arith.constant 0.353553385 : f32
    %17 = vector.broadcast %cst_14 : f32 to vector<8x8xf32>
    %18 = arith.mulf %16, %17 : vector<8x8xf32>
    %19 = vector.shape_cast %18 : vector<8x8xf32> to vector<1x8x8xf32>
    %20 = arith.truncf %19 : vector<1x8x8xf32> to vector<1x8x8xbf16>
    %21 = vector.extract_strided_slice %7 {offsets = [0, 32], sizes = [8, 8], strides = [1, 1]} : vector<8x96xf32> to vector<8x8xf32>
    %22 = vector.shape_cast %21 : vector<8x8xf32> to vector<1x8x8xf32>
    %23 = arith.truncf %22 : vector<1x8x8xf32> to vector<1x8x8xbf16>
    %24 = vector.extract_strided_slice %7 {offsets = [0, 64], sizes = [8, 8], strides = [1, 1]} : vector<8x96xf32> to vector<8x8xf32>
    %25 = vector.shape_cast %24 : vector<8x8xf32> to vector<1x8x8xf32>
    %26 = arith.truncf %25 : vector<1x8x8xf32> to vector<1x8x8xbf16>
    "tpu.trace_start"() <{level = 10 : i32, message = "bqd,bkd->bqk"}> : () -> ()
    %cst_15 = arith.constant dense<0.000000e+00> : vector<1x8x8xf32>
    %27 = tpu.matmul %20, %23, %cst_15 {dimension_numbers = #tpu.dot_dimension_numbers<[2], [2], [1], [1], [0, 0, 0, 1, 1, 1], [0], [0]>} : vector<1x8x8xbf16>, vector<1x8x8xbf16>, vector<1x8x8xf32> -> vector<1x8x8xf32>
    "tpu.trace_stop"() : () -> ()
    %28 = vector.broadcast %13 : vector<1x1x8xf32> to vector<1x8x8xf32>
    %29 = arith.addf %27, %28 : vector<1x8x8xf32>
    %cst_16 = arith.constant dense<0xFF800000> : vector<1x8xf32>
    %30 = vector.multi_reduction <maximumf>, %29, %cst_16 [2] : vector<1x8x8xf32> to vector<1x8xf32>
    %31 = vector.shape_cast %30 : vector<1x8xf32> to vector<1x8x1xf32>
    %32 = vector.broadcast %31 : vector<1x8x1xf32> to vector<1x8x8xf32>
    %33 = arith.subf %29, %32 : vector<1x8x8xf32>
    %34 = math.exp %33 : vector<1x8x8xf32>
    %cst_17 = arith.constant dense<0.000000e+00> : vector<1x8xf32>
    %35 = vector.multi_reduction <add>, %34, %cst_17 [2] : vector<1x8x8xf32> to vector<1x8xf32>
    %36 = vector.shape_cast %35 : vector<1x8xf32> to vector<1x8x1xf32>
    %37 = tpu.reciprocal %36 {approx = true} : vector<1x8x1xf32> -> vector<1x8x1xf32>
    %38 = vector.broadcast %37 : vector<1x8x1xf32> to vector<1x8x8xf32>
    %39 = arith.mulf %34, %38 : vector<1x8x8xf32>
    %40 = arith.truncf %39 : vector<1x8x8xf32> to vector<1x8x8xbf16>
    "tpu.trace_start"() <{level = 10 : i32, message = "bqk,bkd->bqd"}> : () -> ()
    %cst_18 = arith.constant dense<0.000000e+00> : vector<1x8x8xf32>
    %41 = tpu.matmul %40, %26, %cst_18 {dimension_numbers = #tpu.dot_dimension_numbers<[2], [1], [1], [2], [0, 0, 0, 1, 1, 2], [0], [0]>} : vector<1x8x8xbf16>, vector<1x8x8xbf16>, vector<1x8x8xf32> -> vector<1x8x8xf32>
    "tpu.trace_stop"() : () -> ()
    %42 = vector.shape_cast %41 : vector<1x8x8xf32> to vector<8x8xf32>
    %43 = arith.truncf %42 : vector<8x8xf32> to vector<8x8xbf16>
    %44 = vector.extract_strided_slice %14 {offsets = [0, 0], sizes = [8, 32], strides = [1, 1]} : vector<32x32xbf16> to vector<8x32xbf16>
    %cst_19 = arith.constant dense<0.000000e+00> : vector<8x32xf32>
    %45 = tpu.matmul %43, %44, %cst_19 {dimension_numbers = #tpu.dot_dimension_numbers<[1], [0], [0], [1], [0, 0, 1, 1], [], []>} : vector<8x8xbf16>, vector<8x32xbf16>, vector<8x32xf32> -> vector<8x32xf32>
    %46 = arith.addf %15, %45 : vector<8x32xf32>
    %47 = vector.extract_strided_slice %7 {offsets = [0, 8], sizes = [8, 8], strides = [1, 1]} : vector<8x96xf32> to vector<8x8xf32>
    %cst_20 = arith.constant 0.353553385 : f32
    %48 = vector.broadcast %cst_20 : f32 to vector<8x8xf32>
    %49 = arith.mulf %47, %48 : vector<8x8xf32>
    %50 = vector.shape_cast %49 : vector<8x8xf32> to vector<1x8x8xf32>
    %51 = arith.truncf %50 : vector<1x8x8xf32> to vector<1x8x8xbf16>
    %52 = vector.extract_strided_slice %7 {offsets = [0, 40], sizes = [8, 8], strides = [1, 1]} : vector<8x96xf32> to vector<8x8xf32>
    %53 = vector.shape_cast %52 : vector<8x8xf32> to vector<1x8x8xf32>
    %54 = arith.truncf %53 : vector<1x8x8xf32> to vector<1x8x8xbf16>
    %55 = vector.extract_strided_slice %7 {offsets = [0, 72], sizes = [8, 8], strides = [1, 1]} : vector<8x96xf32> to vector<8x8xf32>
    %56 = vector.shape_cast %55 : vector<8x8xf32> to vector<1x8x8xf32>
    %57 = arith.truncf %56 : vector<1x8x8xf32> to vector<1x8x8xbf16>
    "tpu.trace_start"() <{level = 10 : i32, message = "bqd,bkd->bqk"}> : () -> ()
    %cst_21 = arith.constant dense<0.000000e+00> : vector<1x8x8xf32>
    %58 = tpu.matmul %51, %54, %cst_21 {dimension_numbers = #tpu.dot_dimension_numbers<[2], [2], [1], [1], [0, 0, 0, 1, 1, 1], [0], [0]>} : vector<1x8x8xbf16>, vector<1x8x8xbf16>, vector<1x8x8xf32> -> vector<1x8x8xf32>
    "tpu.trace_stop"() : () -> ()
    %59 = vector.broadcast %13 : vector<1x1x8xf32> to vector<1x8x8xf32>
    %60 = arith.addf %58, %59 : vector<1x8x8xf32>
    %cst_22 = arith.constant dense<0xFF800000> : vector<1x8xf32>
    %61 = vector.multi_reduction <maximumf>, %60, %cst_22 [2] : vector<1x8x8xf32> to vector<1x8xf32>
    %62 = vector.shape_cast %61 : vector<1x8xf32> to vector<1x8x1xf32>
    %63 = vector.broadcast %62 : vector<1x8x1xf32> to vector<1x8x8xf32>
    %64 = arith.subf %60, %63 : vector<1x8x8xf32>
    %65 = math.exp %64 : vector<1x8x8xf32>
    %cst_23 = arith.constant dense<0.000000e+00> : vector<1x8xf32>
    %66 = vector.multi_reduction <add>, %65, %cst_23 [2] : vector<1x8x8xf32> to vector<1x8xf32>
    %67 = vector.shape_cast %66 : vector<1x8xf32> to vector<1x8x1xf32>
    %68 = tpu.reciprocal %67 {approx = true} : vector<1x8x1xf32> -> vector<1x8x1xf32>
    %69 = vector.broadcast %68 : vector<1x8x1xf32> to vector<1x8x8xf32>
    %70 = arith.mulf %65, %69 : vector<1x8x8xf32>
    %71 = arith.truncf %70 : vector<1x8x8xf32> to vector<1x8x8xbf16>
    "tpu.trace_start"() <{level = 10 : i32, message = "bqk,bkd->bqd"}> : () -> ()
    %cst_24 = arith.constant dense<0.000000e+00> : vector<1x8x8xf32>
    %72 = tpu.matmul %71, %57, %cst_24 {dimension_numbers = #tpu.dot_dimension_numbers<[2], [1], [1], [2], [0, 0, 0, 1, 1, 2], [0], [0]>} : vector<1x8x8xbf16>, vector<1x8x8xbf16>, vector<1x8x8xf32> -> vector<1x8x8xf32>
    "tpu.trace_stop"() : () -> ()
    %73 = vector.shape_cast %72 : vector<1x8x8xf32> to vector<8x8xf32>
    %74 = arith.truncf %73 : vector<8x8xf32> to vector<8x8xbf16>
    %75 = vector.extract_strided_slice %14 {offsets = [8, 0], sizes = [8, 32], strides = [1, 1]} : vector<32x32xbf16> to vector<8x32xbf16>
    %cst_25 = arith.constant dense<0.000000e+00> : vector<8x32xf32>
    %76 = tpu.matmul %74, %75, %cst_25 {dimension_numbers = #tpu.dot_dimension_numbers<[1], [0], [0], [1], [0, 0, 1, 1], [], []>} : vector<8x8xbf16>, vector<8x32xbf16>, vector<8x32xf32> -> vector<8x32xf32>
    %77 = arith.addf %46, %76 : vector<8x32xf32>
    %78 = vector.extract_strided_slice %7 {offsets = [0, 16], sizes = [8, 8], strides = [1, 1]} : vector<8x96xf32> to vector<8x8xf32>
    %cst_26 = arith.constant 0.353553385 : f32
    %79 = vector.broadcast %cst_26 : f32 to vector<8x8xf32>
    %80 = arith.mulf %78, %79 : vector<8x8xf32>
    %81 = vector.shape_cast %80 : vector<8x8xf32> to vector<1x8x8xf32>
    %82 = arith.truncf %81 : vector<1x8x8xf32> to vector<1x8x8xbf16>
    %83 = vector.extract_strided_slice %7 {offsets = [0, 48], sizes = [8, 8], strides = [1, 1]} : vector<8x96xf32> to vector<8x8xf32>
    %84 = vector.shape_cast %83 : vector<8x8xf32> to vector<1x8x8xf32>
    %85 = arith.truncf %84 : vector<1x8x8xf32> to vector<1x8x8xbf16>
    %86 = vector.extract_strided_slice %7 {offsets = [0, 80], sizes = [8, 8], strides = [1, 1]} : vector<8x96xf32> to vector<8x8xf32>
    %87 = vector.shape_cast %86 : vector<8x8xf32> to vector<1x8x8xf32>
    %88 = arith.truncf %87 : vector<1x8x8xf32> to vector<1x8x8xbf16>
    "tpu.trace_start"() <{level = 10 : i32, message = "bqd,bkd->bqk"}> : () -> ()
    %cst_27 = arith.constant dense<0.000000e+00> : vector<1x8x8xf32>
    %89 = tpu.matmul %82, %85, %cst_27 {dimension_numbers = #tpu.dot_dimension_numbers<[2], [2], [1], [1], [0, 0, 0, 1, 1, 1], [0], [0]>} : vector<1x8x8xbf16>, vector<1x8x8xbf16>, vector<1x8x8xf32> -> vector<1x8x8xf32>
    "tpu.trace_stop"() : () -> ()
    %90 = vector.broadcast %13 : vector<1x1x8xf32> to vector<1x8x8xf32>
    %91 = arith.addf %89, %90 : vector<1x8x8xf32>
    %cst_28 = arith.constant dense<0xFF800000> : vector<1x8xf32>
    %92 = vector.multi_reduction <maximumf>, %91, %cst_28 [2] : vector<1x8x8xf32> to vector<1x8xf32>
    %93 = vector.shape_cast %92 : vector<1x8xf32> to vector<1x8x1xf32>
    %94 = vector.broadcast %93 : vector<1x8x1xf32> to vector<1x8x8xf32>
    %95 = arith.subf %91, %94 : vector<1x8x8xf32>
    %96 = math.exp %95 : vector<1x8x8xf32>
    %cst_29 = arith.constant dense<0.000000e+00> : vector<1x8xf32>
    %97 = vector.multi_reduction <add>, %96, %cst_29 [2] : vector<1x8x8xf32> to vector<1x8xf32>
    %98 = vector.shape_cast %97 : vector<1x8xf32> to vector<1x8x1xf32>
    %99 = tpu.reciprocal %98 {approx = true} : vector<1x8x1xf32> -> vector<1x8x1xf32>
    %100 = vector.broadcast %99 : vector<1x8x1xf32> to vector<1x8x8xf32>
    %101 = arith.mulf %96, %100 : vector<1x8x8xf32>
    %102 = arith.truncf %101 : vector<1x8x8xf32> to vector<1x8x8xbf16>
    "tpu.trace_start"() <{level = 10 : i32, message = "bqk,bkd->bqd"}> : () -> ()
    %cst_30 = arith.constant dense<0.000000e+00> : vector<1x8x8xf32>
    %103 = tpu.matmul %102, %88, %cst_30 {dimension_numbers = #tpu.dot_dimension_numbers<[2], [1], [1], [2], [0, 0, 0, 1, 1, 2], [0], [0]>} : vector<1x8x8xbf16>, vector<1x8x8xbf16>, vector<1x8x8xf32> -> vector<1x8x8xf32>
    "tpu.trace_stop"() : () -> ()
    %104 = vector.shape_cast %103 : vector<1x8x8xf32> to vector<8x8xf32>
    %105 = arith.truncf %104 : vector<8x8xf32> to vector<8x8xbf16>
    %106 = vector.extract_strided_slice %14 {offsets = [16, 0], sizes = [8, 32], strides = [1, 1]} : vector<32x32xbf16> to vector<8x32xbf16>
    %cst_31 = arith.constant dense<0.000000e+00> : vector<8x32xf32>
    %107 = tpu.matmul %105, %106, %cst_31 {dimension_numbers = #tpu.dot_dimension_numbers<[1], [0], [0], [1], [0, 0, 1, 1], [], []>} : vector<8x8xbf16>, vector<8x32xbf16>, vector<8x32xf32> -> vector<8x32xf32>
    %108 = arith.addf %77, %107 : vector<8x32xf32>
    %109 = vector.extract_strided_slice %7 {offsets = [0, 24], sizes = [8, 8], strides = [1, 1]} : vector<8x96xf32> to vector<8x8xf32>
    %cst_32 = arith.constant 0.353553385 : f32
    %110 = vector.broadcast %cst_32 : f32 to vector<8x8xf32>
    %111 = arith.mulf %109, %110 : vector<8x8xf32>
    %112 = vector.shape_cast %111 : vector<8x8xf32> to vector<1x8x8xf32>
    %113 = arith.truncf %112 : vector<1x8x8xf32> to vector<1x8x8xbf16>
    %114 = vector.extract_strided_slice %7 {offsets = [0, 56], sizes = [8, 8], strides = [1, 1]} : vector<8x96xf32> to vector<8x8xf32>
    %115 = vector.shape_cast %114 : vector<8x8xf32> to vector<1x8x8xf32>
    %116 = arith.truncf %115 : vector<1x8x8xf32> to vector<1x8x8xbf16>
    %117 = vector.extract_strided_slice %7 {offsets = [0, 88], sizes = [8, 8], strides = [1, 1]} : vector<8x96xf32> to vector<8x8xf32>
    %118 = vector.shape_cast %117 : vector<8x8xf32> to vector<1x8x8xf32>
    %119 = arith.truncf %118 : vector<1x8x8xf32> to vector<1x8x8xbf16>
    "tpu.trace_start"() <{level = 10 : i32, message = "bqd,bkd->bqk"}> : () -> ()
    %cst_33 = arith.constant dense<0.000000e+00> : vector<1x8x8xf32>
    %120 = tpu.matmul %113, %116, %cst_33 {dimension_numbers = #tpu.dot_dimension_numbers<[2], [2], [1], [1], [0, 0, 0, 1, 1, 1], [0], [0]>} : vector<1x8x8xbf16>, vector<1x8x8xbf16>, vector<1x8x8xf32> -> vector<1x8x8xf32>
    "tpu.trace_stop"() : () -> ()
    %121 = vector.broadcast %13 : vector<1x1x8xf32> to vector<1x8x8xf32>
    %122 = arith.addf %120, %121 : vector<1x8x8xf32>
    %cst_34 = arith.constant dense<0xFF800000> : vector<1x8xf32>
    %123 = vector.multi_reduction <maximumf>, %122, %cst_34 [2] : vector<1x8x8xf32> to vector<1x8xf32>
    %124 = vector.shape_cast %123 : vector<1x8xf32> to vector<1x8x1xf32>
    %125 = vector.broadcast %124 : vector<1x8x1xf32> to vector<1x8x8xf32>
    %126 = arith.subf %122, %125 : vector<1x8x8xf32>
    %127 = math.exp %126 : vector<1x8x8xf32>
    %cst_35 = arith.constant dense<0.000000e+00> : vector<1x8xf32>
    %128 = vector.multi_reduction <add>, %127, %cst_35 [2] : vector<1x8x8xf32> to vector<1x8xf32>
    %129 = vector.shape_cast %128 : vector<1x8xf32> to vector<1x8x1xf32>
    %130 = tpu.reciprocal %129 {approx = true} : vector<1x8x1xf32> -> vector<1x8x1xf32>
    %131 = vector.broadcast %130 : vector<1x8x1xf32> to vector<1x8x8xf32>
    %132 = arith.mulf %127, %131 : vector<1x8x8xf32>
    %133 = arith.truncf %132 : vector<1x8x8xf32> to vector<1x8x8xbf16>
    "tpu.trace_start"() <{level = 10 : i32, message = "bqk,bkd->bqd"}> : () -> ()
    %cst_36 = arith.constant dense<0.000000e+00> : vector<1x8x8xf32>
    %134 = tpu.matmul %133, %119, %cst_36 {dimension_numbers = #tpu.dot_dimension_numbers<[2], [1], [1], [2], [0, 0, 0, 1, 1, 2], [0], [0]>} : vector<1x8x8xbf16>, vector<1x8x8xbf16>, vector<1x8x8xf32> -> vector<1x8x8xf32>
    "tpu.trace_stop"() : () -> ()
    %135 = vector.shape_cast %134 : vector<1x8x8xf32> to vector<8x8xf32>
    %136 = arith.truncf %135 : vector<8x8xf32> to vector<8x8xbf16>
    %137 = vector.extract_strided_slice %14 {offsets = [24, 0], sizes = [8, 32], strides = [1, 1]} : vector<32x32xbf16> to vector<8x32xbf16>
    %cst_37 = arith.constant dense<0.000000e+00> : vector<8x32xf32>
    %138 = tpu.matmul %136, %137, %cst_37 {dimension_numbers = #tpu.dot_dimension_numbers<[1], [0], [0], [1], [0, 0, 1, 1], [], []>} : vector<8x8xbf16>, vector<8x32xbf16>, vector<8x32xf32> -> vector<8x32xf32>
    %139 = arith.addf %108, %138 : vector<8x32xf32>
    %c0_38 = arith.constant 0 : index
    %c0_39 = arith.constant 0 : index
    %140 = vector.load %arg6[%c0_38, %c0_39] : memref<1x32xf32, #tpu.memory_space<vmem>>, vector<1x32xf32>
    %141 = vector.broadcast %140 : vector<1x32xf32> to vector<8x32xf32>
    %142 = arith.addf %139, %141 : vector<8x32xf32>
    %143 = arith.addf %142, %1 : vector<8x32xf32>
    %c0_40 = arith.constant 0 : index
    %c0_41 = arith.constant 0 : index
    %144 = vector.load %arg7[%c0_40, %c0_41] : memref<1x32xf32, #tpu.memory_space<vmem>>, vector<1x32xf32>
    %c0_42 = arith.constant 0 : index
    %c0_43 = arith.constant 0 : index
    %145 = vector.load %arg8[%c0_42, %c0_43] : memref<1x32xf32, #tpu.memory_space<vmem>>, vector<1x32xf32>
    %cst_44 = arith.constant dense<0.000000e+00> : vector<8xf32>
    %146 = vector.multi_reduction <add>, %143, %cst_44 [1] : vector<8x32xf32> to vector<8xf32>
    %147 = vector.shape_cast %146 : vector<8xf32> to vector<8x1xf32>
    %cst_45 = arith.constant 3.200000e+01 : f32
    %148 = vector.broadcast %cst_45 : f32 to vector<8x1xf32>
    %149 = arith.divf %147, %148 : vector<8x1xf32>
    %150 = vector.broadcast %149 : vector<8x1xf32> to vector<8x32xf32>
    %151 = arith.subf %143, %150 : vector<8x32xf32>
    %152 = arith.mulf %151, %151 : vector<8x32xf32>
    %cst_46 = arith.constant dense<0.000000e+00> : vector<8xf32>
    %153 = vector.multi_reduction <add>, %152, %cst_46 [1] : vector<8x32xf32> to vector<8xf32>
    %154 = vector.shape_cast %153 : vector<8xf32> to vector<8x1xf32>
    %cst_47 = arith.constant 3.200000e+01 : f32
    %155 = vector.broadcast %cst_47 : f32 to vector<8x1xf32>
    %156 = arith.divf %154, %155 : vector<8x1xf32>
    %cst_48 = arith.constant 9.99999974E-6 : f32
    %157 = vector.broadcast %cst_48 : f32 to vector<8x1xf32>
    %158 = arith.addf %156, %157 : vector<8x1xf32>
    %159 = math.rsqrt %158 : vector<8x1xf32>
    %160 = vector.broadcast %159 : vector<8x1xf32> to vector<8x32xf32>
    %161 = arith.mulf %151, %160 : vector<8x32xf32>
    %162 = vector.broadcast %144 : vector<1x32xf32> to vector<8x32xf32>
    %163 = arith.mulf %161, %162 : vector<8x32xf32>
    %164 = vector.broadcast %145 : vector<1x32xf32> to vector<8x32xf32>
    %165 = arith.addf %163, %164 : vector<8x32xf32>
    %166 = arith.truncf %165 : vector<8x32xf32> to vector<8x32xbf16>
    %c0_49 = arith.constant 0 : index
    %c0_50 = arith.constant 0 : index
    %167 = vector.load %arg9[%c0_49, %c0_50] : memref<32x64xbf16, #tpu.memory_space<vmem>>, vector<32x64xbf16>
    %cst_51 = arith.constant dense<0.000000e+00> : vector<8x64xf32>
    %168 = tpu.matmul %166, %167, %cst_51 {dimension_numbers = #tpu.dot_dimension_numbers<[1], [0], [0], [1], [0, 0, 1, 1], [], []>} : vector<8x32xbf16>, vector<32x64xbf16>, vector<8x64xf32> -> vector<8x64xf32>
    %c0_52 = arith.constant 0 : index
    %c0_53 = arith.constant 0 : index
    %169 = vector.load %arg10[%c0_52, %c0_53] : memref<1x64xf32, #tpu.memory_space<vmem>>, vector<1x64xf32>
    %170 = vector.broadcast %169 : vector<1x64xf32> to vector<8x64xf32>
    %171 = arith.addf %168, %170 : vector<8x64xf32>
    %cst_54 = arith.constant 0.000000e+00 : f32
    %172 = vector.broadcast %cst_54 : f32 to vector<8x64xf32>
    %173 = arith.maximumf %171, %172 : vector<8x64xf32>
    %174 = arith.truncf %173 : vector<8x64xf32> to vector<8x64xbf16>
    %c0_55 = arith.constant 0 : index
    %c0_56 = arith.constant 0 : index
    %175 = vector.load %arg11[%c0_55, %c0_56] : memref<64x32xbf16, #tpu.memory_space<vmem>>, vector<64x32xbf16>
    %cst_57 = arith.constant dense<0.000000e+00> : vector<8x32xf32>
    %176 = tpu.matmul %174, %175, %cst_57 {dimension_numbers = #tpu.dot_dimension_numbers<[1], [0], [0], [1], [0, 0, 1, 1], [], []>} : vector<8x64xbf16>, vector<64x32xbf16>, vector<8x32xf32> -> vector<8x32xf32>
    %c0_58 = arith.constant 0 : index
    %c0_59 = arith.constant 0 : index
    %177 = vector.load %arg12[%c0_58, %c0_59] : memref<1x32xf32, #tpu.memory_space<vmem>>, vector<1x32xf32>
    %178 = vector.broadcast %177 : vector<1x32xf32> to vector<8x32xf32>
    %179 = arith.addf %176, %178 : vector<8x32xf32>
    %180 = arith.addf %165, %179 : vector<8x32xf32>
    %c0_60 = arith.constant 0 : index
    %c0_61 = arith.constant 0 : index
    %181 = vector.load %arg13[%c0_60, %c0_61] : memref<1x32xf32, #tpu.memory_space<vmem>>, vector<1x32xf32>
    %c0_62 = arith.constant 0 : index
    %c0_63 = arith.constant 0 : index
    %182 = vector.load %arg14[%c0_62, %c0_63] : memref<1x32xf32, #tpu.memory_space<vmem>>, vector<1x32xf32>
    %cst_64 = arith.constant dense<0.000000e+00> : vector<8xf32>
    %183 = vector.multi_reduction <add>, %180, %cst_64 [1] : vector<8x32xf32> to vector<8xf32>
    %184 = vector.shape_cast %183 : vector<8xf32> to vector<8x1xf32>
    %cst_65 = arith.constant 3.200000e+01 : f32
    %185 = vector.broadcast %cst_65 : f32 to vector<8x1xf32>
    %186 = arith.divf %184, %185 : vector<8x1xf32>
    %187 = vector.broadcast %186 : vector<8x1xf32> to vector<8x32xf32>
    %188 = arith.subf %180, %187 : vector<8x32xf32>
    %189 = arith.mulf %188, %188 : vector<8x32xf32>
    %cst_66 = arith.constant dense<0.000000e+00> : vector<8xf32>
    %190 = vector.multi_reduction <add>, %189, %cst_66 [1] : vector<8x32xf32> to vector<8xf32>
    %191 = vector.shape_cast %190 : vector<8xf32> to vector<8x1xf32>
    %cst_67 = arith.constant 3.200000e+01 : f32
    %192 = vector.broadcast %cst_67 : f32 to vector<8x1xf32>
    %193 = arith.divf %191, %192 : vector<8x1xf32>
    %cst_68 = arith.constant 9.99999974E-6 : f32
    %194 = vector.broadcast %cst_68 : f32 to vector<8x1xf32>
    %195 = arith.addf %193, %194 : vector<8x1xf32>
    %196 = math.rsqrt %195 : vector<8x1xf32>
    %197 = vector.broadcast %196 : vector<8x1xf32> to vector<8x32xf32>
    %198 = arith.mulf %188, %197 : vector<8x32xf32>
    %199 = vector.broadcast %181 : vector<1x32xf32> to vector<8x32xf32>
    %200 = arith.mulf %198, %199 : vector<8x32xf32>
    %201 = vector.broadcast %182 : vector<1x32xf32> to vector<8x32xf32>
    %202 = arith.addf %200, %201 : vector<8x32xf32>
    %203 = vector.shape_cast %202 : vector<8x32xf32> to vector<1x8x32xf32>
    %c0_69 = arith.constant 0 : index
    %c0_70 = arith.constant 0 : index
    %c0_71 = arith.constant 0 : index
    %204 = vector.load %arg15[%c0_69, %c0_70, %c0_71] : memref<1x8x32xf32, #tpu.memory_space<vmem>>, vector<1x8x32xf32>
    tpu.vector_store %arg15[%c0_69, %c0_70, %c0_71], %203 {strides = array<i32>} : memref<1x8x32xf32, #tpu.memory_space<vmem>>, vector<1x8x32xf32>,
    return
  }
  func.func @transform_0(%arg0: i32) -> (i32, i32, i32) {
    %c0_i32 = arith.constant 0 : i32
    %c0_i32_0 = arith.constant 0 : i32
    %c0_i32_1 = arith.constant 0 : i32
    return %arg0, %c0_i32, %c0_i32_0 : i32, i32, i32
  }
  func.func @transform_1(%arg0: i32) -> (i32, i32, i32) {
    %c0_i32 = arith.constant 0 : i32
    %c0_i32_0 = arith.constant 0 : i32
    %c0_i32_1 = arith.constant 0 : i32
    return %arg0, %c0_i32, %c0_i32_0 : i32, i32, i32
  }
  func.func @transform_2(%arg0: i32) -> (i32, i32) {
    %c0_i32 = arith.constant 0 : i32
    %c0_i32_0 = arith.constant 0 : i32
    %c0_i32_1 = arith.constant 0 : i32
    return %c0_i32, %c0_i32_0 : i32, i32
  }
  func.func @transform_3(%arg0: i32) -> (i32, i32) {
    %c0_i32 = arith.constant 0 : i32
    %c0_i32_0 = arith.constant 0 : i32
    %c0_i32_1 = arith.constant 0 : i32
    return %c0_i32, %c0_i32_0 : i32, i32
  }
  func.func @transform_4(%arg0: i32) -> (i32, i32) {
    %c0_i32 = arith.constant 0 : i32
    %c0_i32_0 = arith.constant 0 : i32
    %c0_i32_1 = arith.constant 0 : i32
    return %c0_i32, %c0_i32_0 : i32, i32
  }
  func.func @transform_5(%arg0: i32) -> (i32, i32) {
    %c0_i32 = arith.constant 0 : i32
    %c0_i32_0 = arith.constant 0 : i32
    %c0_i32_1 = arith.constant 0 : i32
    return %c0_i32, %c0_i32_0 : i32, i32
  }
  func.func @transform_6(%arg0: i32) -> (i32, i32) {
    %c0_i32 = arith.constant 0 : i32
    %c0_i32_0 = arith.constant 0 : i32
    %c0_i32_1 = arith.constant 0 : i32
    return %c0_i32, %c0_i32_0 : i32, i32
  }
  func.func @transform_7(%arg0: i32) -> (i32, i32) {
    %c0_i32 = arith.constant 0 : i32
    %c0_i32_0 = arith.constant 0 : i32
    %c0_i32_1 = arith.constant 0 : i32
    return %c0_i32, %c0_i32_0 : i32, i32
  }
  func.func @transform_8(%arg0: i32) -> (i32, i32) {
    %c0_i32 = arith.constant 0 : i32
    %c0_i32_0 = arith.constant 0 : i32
    %c0_i32_1 = arith.constant 0 : i32
    return %c0_i32, %c0_i32_0 : i32, i32
  }
  func.func @transform_9(%arg0: i32) -> (i32, i32) {
    %c0_i32 = arith.constant 0 : i32
    %c0_i32_0 = arith.constant 0 : i32
    %c0_i32_1 = arith.constant 0 : i32
    return %c0_i32, %c0_i32_0 : i32, i32
  }
  func.func @transform_10(%arg0: i32) -> (i32, i32) {
    %c0_i32 = arith.constant 0 : i32
    %c0_i32_0 = arith.constant 0 : i32
    %c0_i32_1 = arith.constant 0 : i32
    return %c0_i32, %c0_i32_0 : i32, i32
  }
  func.func @transform_11(%arg0: i32) -> (i32, i32) {
    %c0_i32 = arith.constant 0 : i32
    %c0_i32_0 = arith.constant 0 : i32
    %c0_i32_1 = arith.constant 0 : i32
    return %c0_i32, %c0_i32_0 : i32, i32
  }
  func.func @transform_12(%arg0: i32) -> (i32, i32) {
    %c0_i32 = arith.constant 0 : i32
    %c0_i32_0 = arith.constant 0 : i32
    %c0_i32_1 = arith.constant 0 : i32
    return %c0_i32, %c0_i32_0 : i32, i32
  }
  func.func @transform_13(%arg0: i32) -> (i32, i32) {
    %c0_i32 = arith.constant 0 : i32
    %c0_i32_0 = arith.constant 0 : i32
    %c0_i32_1 = arith.constant 0 : i32
    return %c0_i32, %c0_i32_0 : i32, i32
  }
  func.func @transform_14(%arg0: i32) -> (i32, i32, i32) {
    %c0_i32 = arith.constant 0 : i32
    %c0_i32_0 = arith.constant 0 : i32
    %c0_i32_1 = arith.constant 0 : i32
    return %arg0, %c0_i32, %c0_i32_0 : i32, i32, i32
  }
}

module attributes {stable_mosaic.version = 11 : i64} {
  func.func @_encoder_layer_kernel(%arg0: i32, %arg1: memref<1x1x8xi32, #tpu.memory_space<vmem>>, %arg2: memref<1x8x32xf32, #tpu.memory_space<vmem>>, %arg3: memref<32x96xbf16, #tpu.memory_space<vmem>>, %arg4: memref<1x96xf32, #tpu.memory_space<vmem>>, %arg5: memref<32x32xbf16, #tpu.memory_space<vmem>>, %arg6: memref<1x32xf32, #tpu.memory_space<vmem>>, %arg7: memref<1x32xf32, #tpu.memory_space<vmem>>, %arg8: memref<1x32xf32, #tpu.memory_space<vmem>>, %arg9: memref<32x64xbf16, #tpu.memory_space<vmem>>, %arg10: memref<1x64xf32, #tpu.memory_space<vmem>>, %arg11: memref<64x32xbf16, #tpu.memory_space<vmem>>, %arg12: memref<1x32xf32, #tpu.memory_space<vmem>>, %arg13: memref<1x32xf32, #tpu.memory_space<vmem>>, %arg14: memref<1x32xf32, #tpu.memory_space<vmem>>, %arg15: memref<1x8x32xf32, #tpu.memory_space<vmem>>) attributes {dimension_semantics = [#tpu.dimension_semantics<parallel>], iteration_bounds = array<i64: 2>, scalar_prefetch = 0 : i64, scratch_operands = 0 : i64, tpu.core_type = #tpu.core_type<tc>, window_params = [{transform_indices = @transform_0, window_bounds = array<i64: 1, 1, 8>}, {transform_indices = @transform_1, window_bounds = array<i64: 1, 8, 32>}, {pipeline_mode = #tpu.pipeline_mode<synchronous>, transform_indices = @transform_2, window_bounds = array<i64: 32, 96>}, {pipeline_mode = #tpu.pipeline_mode<synchronous>, transform_indices = @transform_3, window_bounds = array<i64: 1, 96>}, {pipeline_mode = #tpu.pipeline_mode<synchronous>, transform_indices = @transform_4, window_bounds = array<i64: 32, 32>}, {pipeline_mode = #tpu.pipeline_mode<synchronous>, transform_indices = @transform_5, window_bounds = array<i64: 1, 32>}, {pipeline_mode = #tpu.pipeline_mode<synchronous>, transform_indices = @transform_6, window_bounds = array<i64: 1, 32>}, {pipeline_mode = #tpu.pipeline_mode<synchronous>, transform_indices = @transform_7, window_bounds = array<i64: 1, 32>}, {pipeline_mode = #tpu.pipeline_mode<synchronous>, transform_indices = @transform_8, window_bounds = array<i64: 32, 64>}, {pipeline_mode = #tpu.pipeline_mode<synchronous>, transform_indices = @transform_9, window_bounds = array<i64: 1, 64>}, {pipeline_mode = #tpu.pipeline_mode<synchronous>, transform_indices = @transform_10, window_bounds = array<i64: 64, 32>}, {pipeline_mode = #tpu.pipeline_mode<synchronous>, transform_indices = @transform_11, window_bounds = array<i64: 1, 32>}, {pipeline_mode = #tpu.pipeline_mode<synchronous>, transform_indices = @transform_12, window_bounds = array<i64: 1, 32>}, {pipeline_mode = #tpu.pipeline_mode<synchronous>, transform_indices = @transform_13, window_bounds = array<i64: 1, 32>}, {transform_indices = @transform_14, window_bounds = array<i64: 1, 8, 32>}]} {
    %c0 = arith.constant 0 : index
    %c0_0 = arith.constant 0 : index
    %c0_1 = arith.constant 0 : index
    %0 = vector.load %arg2[%c0, %c0_0, %c0_1] : memref<1x8x32xf32, #tpu.memory_space<vmem>>, vector<1x8x32xf32>
    %1 = vector.shape_cast %0 : vector<1x8x32xf32> to vector<8x32xf32>
    %2 = arith.truncf %1 : vector<8x32xf32> to vector<8x32xbf16>
    %c0_2 = arith.constant 0 : index
    %c0_3 = arith.constant 0 : index
    %3 = vector.load %arg3[%c0_2, %c0_3] : memref<32x96xbf16, #tpu.memory_space<vmem>>, vector<32x96xbf16>
    %cst = arith.constant dense<0.000000e+00> : vector<8x96xf32>
    %4 = tpu.matmul %2, %3, %cst {dimension_numbers = #tpu.dot_dimension_numbers<[1], [0], [0], [1], [0, 0, 1, 1], [], []>} : vector<8x32xbf16>, vector<32x96xbf16>, vector<8x96xf32> -> vector<8x96xf32>
    %c0_4 = arith.constant 0 : index
    %c0_5 = arith.constant 0 : index
    %5 = vector.load %arg4[%c0_4, %c0_5] : memref<1x96xf32, #tpu.memory_space<vmem>>, vector<1x96xf32>
    %6 = vector.broadcast %5 : vector<1x96xf32> to vector<8x96xf32>
    %7 = arith.addf %4, %6 : vector<8x96xf32>
    %c0_6 = arith.constant 0 : index
    %c0_7 = arith.constant 0 : index
    %c0_8 = arith.constant 0 : index
    %8 = vector.load %arg1[%c0_6, %c0_7, %c0_8] : memref<1x1x8xi32, #tpu.memory_space<vmem>>, vector<1x1x8xi32>
    %c0_i32 = arith.constant 0 : i32
    %9 = vector.broadcast %c0_i32 : i32 to vector<1x1x8xi32>
    %10 = arith.cmpi ne, %8, %9 : vector<1x1x8xi32>
    %cst_9 = arith.constant -1.000000e+09 : f32
    %cst_10 = arith.constant 0.000000e+00 : f32
    %11 = vector.broadcast %cst_9 : f32 to vector<1x1x8xf32>
    %12 = vector.broadcast %cst_10 : f32 to vector<1x1x8xf32>
    %13 = arith.select %10, %11, %12 : vector<1x1x8xi1>, vector<1x1x8xf32>
    %c0_11 = arith.constant 0 : index
    %c0_12 = arith.constant 0 : index
    %14 = vector.load %arg5[%c0_11, %c0_12] : memref<32x32xbf16, #tpu.memory_space<vmem>>, vector<32x32xbf16>
    %cst_13 = arith.constant 0.000000e+00 : f32
    %15 = vector.broadcast %cst_13 : f32 to vector<8x32xf32>
    %16 = vector.extract_strided_slice %7 {offsets = [0, 0], sizes = [8, 8], strides = [1, 1]} : vector<8x96xf32> to vector<8x8xf32>
    %cst_14 = arith.constant 0.353553385 : f32
    %17 = vector.broadcast %cst_14 : f32 to vector<8x8xf32>
    %18 = arith.mulf %16, %17 : vector<8x8xf32>
    %19 = vector.shape_cast %18 : vector<8x8xf32> to vector<1x8x8xf32>
    %20 = arith.truncf %19 : vector<1x8x8xf32> to vector<1x8x8xbf16>
    %21 = vector.extract_strided_slice %7 {offsets = [0, 32], sizes = [8, 8], strides = [1, 1]} : vector<8x96xf32> to vector<8x8xf32>
    %22 = vector.shape_cast %21 : vector<8x8xf32> to vector<1x8x8xf32>
    %23 = arith.truncf %22 : vector<1x8x8xf32> to vector<1x8x8xbf16>
    %24 = vector.extract_strided_slice %7 {offsets = [0, 64], sizes = [8, 8], strides = [1, 1]} : vector<8x96xf32> to vector<8x8xf32>
    %25 = vector.shape_cast %24 : vector<8x8xf32> to vector<1x8x8xf32>
    %26 = arith.truncf %25 : vector<1x8x8xf32> to vector<1x8x8xbf16>
    "tpu.trace_start"() <{level = 10 : i32, message = "bqd,bkd->bqk"}> : () -> ()
    %cst_15 = arith.constant dense<0.000000e+00> : vector<1x8x8xf32>
    %27 = tpu.matmul %20, %23, %cst_15 {dimension_numbers = #tpu.dot_dimension_numbers<[2], [2], [1], [1], [0, 0, 0, 1, 1, 1], [0], [0]>} : vector<1x8x8xbf16>, vector<1x8x8xbf16>, vector<1x8x8xf32> -> vector<1x8x8xf32>
    "tpu.trace_stop"() : () -> ()
    %28 = vector.broadcast %13 : vector<1x1x8xf32> to vector<1x8x8xf32>
    %29 = arith.addf %27, %28 : vector<1x8x8xf32>
    %cst_16 = arith.constant dense<0xFF800000> : vector<1x8xf32>
    %30 = vector.multi_reduction <maximumf>, %29, %cst_16 [2] : vector<1x8x8xf32> to vector<1x8xf32>
    %31 = vector.shape_cast %30 : vector<1x8xf32> to vector<1x8x1xf32>
    %32 = vector.broadcast %31 : vector<1x8x1xf32> to vector<1x8x8xf32>
    %33 = arith.subf %29, %32 : vector<1x8x8xf32>
    %34 = math.exp %33 : vector<1x8x8xf32>
    %cst_17 = arith.constant dense<0.000000e+00> : vector<1x8xf32>
    %35 = vector.multi_reduction <add>, %34, %cst_17 [2] : vector<1x8x8xf32> to vector<1x8xf32>
    %36 = vector.shape_cast %35 : vector<1x8xf32> to vector<1x8x1xf32>
    %37 = tpu.reciprocal %36 {approx = true} : vector<1x8x1xf32> -> vector<1x8x1xf32>
    %38 = vector.broadcast %37 : vector<1x8x1xf32> to vector<1x8x8xf32>
    %39 = arith.mulf %34, %38 : vector<1x8x8xf32>
    %40 = arith.truncf %39 : vector<1x8x8xf32> to vector<1x8x8xbf16>
    "tpu.trace_start"() <{level = 10 : i32, message = "bqk,bkd->bqd"}> : () -> ()
    %cst_18 = arith.constant dense<0.000000e+00> : vector<1x8x8xf32>
    %41 = tpu.matmul %40, %26, %cst_18 {dimension_numbers = #tpu.dot_dimension_numbers<[2], [1], [1], [2], [0, 0, 0, 1, 1, 2], [0], [0]>} : vector<1x8x8xbf16>, vector<1x8x8xbf16>, vector<1x8x8xf32> -> vector<1x8x8xf32>
    "tpu.trace_stop"() : () -> ()
    %42 = vector.shape_cast %41 : vector<1x8x8xf32> to vector<8x8xf32>
    %43 = arith.truncf %42 : vector<8x8xf32> to vector<8x8xbf16>
    %44 = vector.extract_strided_slice %14 {offsets = [0, 0], sizes = [8, 32], strides = [1, 1]} : vector<32x32xbf16> to vector<8x32xbf16>
    %cst_19 = arith.constant dense<0.000000e+00> : vector<8x32xf32>
    %45 = tpu.matmul %43, %44, %cst_19 {dimension_numbers = #tpu.dot_dimension_numbers<[1], [0], [0], [1], [0, 0, 1, 1], [], []>} : vector<8x8xbf16>, vector<8x32xbf16>, vector<8x32xf32> -> vector<8x32xf32>
    %46 = arith.addf %15, %45 : vector<8x32xf32>
    %47 = vector.extract_strided_slice %7 {offsets = [0, 8], sizes = [8, 8], strides = [1, 1]} : vector<8x96xf32> to vector<8x8xf32>
    %cst_20 = arith.constant 0.353553385 : f32
    %48 = vector.broadcast %cst_20 : f32 to vector<8x8xf32>
    %49 = arith.mulf %47, %48 : vector<8x8xf32>
    %50 = vector.shape_cast %49 : vector<8x8xf32> to vector<1x8x8xf32>
    %51 = arith.truncf %50 : vector<1x8x8xf32> to vector<1x8x8xbf16>
    %52 = vector.extract_strided_slice %7 {offsets = [0, 40], sizes = [8, 8], strides = [1, 1]} : vector<8x96xf32> to vector<8x8xf32>
    %53 = vector.shape_cast %52 : vector<8x8xf32> to vector<1x8x8xf32>
    %54 = arith.truncf %53 : vector<1x8x8xf32> to vector<1x8x8xbf16>
    %55 = vector.extract_strided_slice %7 {offsets = [0, 72], sizes = [8, 8], strides = [1, 1]} : vector<8x96xf32> to vector<8x8xf32>
    %56 = vector.shape_cast %55 : vector<8x8xf32> to vector<1x8x8xf32>
    %57 = arith.truncf %56 : vector<1x8x8xf32> to vector<1x8x8xbf16>
    "tpu.trace_start"() <{level = 10 : i32, message = "bqd,bkd->bqk"}> : () -> ()
    %cst_21 = arith.constant dense<0.000000e+00> : vector<1x8x8xf32>
    %58 = tpu.matmul %51, %54, %cst_21 {dimension_numbers = #tpu.dot_dimension_numbers<[2], [2], [1], [1], [0, 0, 0, 1, 1, 1], [0], [0]>} : vector<1x8x8xbf16>, vector<1x8x8xbf16>, vector<1x8x8xf32> -> vector<1x8x8xf32>
    "tpu.trace_stop"() : () -> ()
    %59 = vector.broadcast %13 : vector<1x1x8xf32> to vector<1x8x8xf32>
    %60 = arith.addf %58, %59 : vector<1x8x8xf32>
    %cst_22 = arith.constant dense<0xFF800000> : vector<1x8xf32>
    %61 = vector.multi_reduction <maximumf>, %60, %cst_22 [2] : vector<1x8x8xf32> to vector<1x8xf32>
    %62 = vector.shape_cast %61 : vector<1x8xf32> to vector<1x8x1xf32>
    %63 = vector.broadcast %62 : vector<1x8x1xf32> to vector<1x8x8xf32>
    %64 = arith.subf %60, %63 : vector<1x8x8xf32>
    %65 = math.exp %64 : vector<1x8x8xf32>
    %cst_23 = arith.constant dense<0.000000e+00> : vector<1x8xf32>
    %66 = vector.multi_reduction <add>, %65, %cst_23 [2] : vector<1x8x8xf32> to vector<1x8xf32>
    %67 = vector.shape_cast %66 : vector<1x8xf32> to vector<1x8x1xf32>
    %68 = tpu.reciprocal %67 {approx = true} : vector<1x8x1xf32> -> vector<1x8x1xf32>
    %69 = vector.broadcast %68 : vector<1x8x1xf32> to vector<1x8x8xf32>
    %70 = arith.mulf %65, %69 : vector<1x8x8xf32>
    %71 = arith.truncf %70 : vector<1x8x8xf32> to vector<1x8x8xbf16>
    "tpu.trace_start"() <{level = 10 : i32, message = "bqk,bkd->bqd"}> : () -> ()
    %cst_24 = arith.constant dense<0.000000e+00> : vector<1x8x8xf32>
    %72 = tpu.matmul %71, %57, %cst_24 {dimension_numbers = #tpu.dot_dimension_numbers<[2], [1], [1], [2], [0, 0, 0, 1, 1, 2], [0], [0]>} : vector<1x8x8xbf16>, vector<1x8x8xbf16>, vector<1x8x8xf32> -> vector<1x8x8xf32>
    "tpu.trace_stop"() : () -> ()
    %73 = vector.shape_cast %72 : vector<1x8x8xf32> to vector<8x8xf32>
    %74 = arith.truncf %73 : vector<8x8xf32> to vector<8x8xbf16>
    %75 = vector.extract_strided_slice %14 {offsets = [8, 0], sizes = [8, 32], strides = [1, 1]} : vector<32x32xbf16> to vector<8x32xbf16>
    %cst_25 = arith.constant dense<0.000000e+00> : vector<8x32xf32>
    %76 = tpu.matmul %74, %75, %cst_25 {dimension_numbers = #tpu.dot_dimension_numbers<[1], [0], [0], [1], [0, 0, 1, 1], [], []>} : vector<8x8xbf16>, vector<8x32xbf16>, vector<8x32xf32> -> vector<8x32xf32>
    %77 = arith.addf %46, %76 : vector<8x32xf32>
    %78 = vector.extract_strided_slice %7 {offsets = [0, 16], sizes = [8, 8], strides = [1, 1]} : vector<8x96xf32> to vector<8x8xf32>
    %cst_26 = arith.constant 0.353553385 : f32
    %79 = vector.broadcast %cst_26 : f32 to vector<8x8xf32>
    %80 = arith.mulf %78, %79 : vector<8x8xf32>
    %81 = vector.shape_cast %80 : vector<8x8xf32> to vector<1x8x8xf32>
    %82 = arith.truncf %81 : vector<1x8x8xf32> to vector<1x8x8xbf16>
    %83 = vector.extract_strided_slice %7 {offsets = [0, 48], sizes = [8, 8], strides = [1, 1]} : vector<8x96xf32> to vector<8x8xf32>
    %84 = vector.shape_cast %83 : vector<8x8xf32> to vector<1x8x8xf32>
    %85 = arith.truncf %84 : vector<1x8x8xf32> to vector<1x8x8xbf16>
    %86 = vector.extract_strided_slice %7 {offsets = [0, 80], sizes = [8, 8], strides = [1, 1]} : vector<8x96xf32> to vector<8x8xf32>
    %87 = vector.shape_cast %86 : vector<8x8xf32> to vector<1x8x8xf32>
    %88 = arith.truncf %87 : vector<1x8x8xf32> to vector<1x8x8xbf16>
    "tpu.trace_start"() <{level = 10 : i32, message = "bqd,bkd->bqk"}> : () -> ()
    %cst_27 = arith.constant dense<0.000000e+00> : vector<1x8x8xf32>
    %89 = tpu.matmul %82, %85, %cst_27 {dimension_numbers = #tpu.dot_dimension_numbers<[2], [2], [1], [1], [0, 0, 0, 1, 1, 1], [0], [0]>} : vector<1x8x8xbf16>, vector<1x8x8xbf16>, vector<1x8x8xf32> -> vector<1x8x8xf32>
    "tpu.trace_stop"() : () -> ()
    %90 = vector.broadcast %13 : vector<1x1x8xf32> to vector<1x8x8xf32>
    %91 = arith.addf %89, %90 : vector<1x8x8xf32>
    %cst_28 = arith.constant dense<0xFF800000> : vector<1x8xf32>
    %92 = vector.multi_reduction <maximumf>, %91, %cst_28 [2] : vector<1x8x8xf32> to vector<1x8xf32>
    %93 = vector.shape_cast %92 : vector<1x8xf32> to vector<1x8x1xf32>
    %94 = vector.broadcast %93 : vector<1x8x1xf32> to vector<1x8x8xf32>
    %95 = arith.subf %91, %94 : vector<1x8x8xf32>
    %96 = math.exp %95 : vector<1x8x8xf32>
    %cst_29 = arith.constant dense<0.000000e+00> : vector<1x8xf32>
    %97 = vector.multi_reduction <add>, %96, %cst_29 [2] : vector<1x8x8xf32> to vector<1x8xf32>
    %98 = vector.shape_cast %97 : vector<1x8xf32> to vector<1x8x1xf32>
    %99 = tpu.reciprocal %98 {approx = true} : vector<1x8x1xf32> -> vector<1x8x1xf32>
    %100 = vector.broadcast %99 : vector<1x8x1xf32> to vector<1x8x8xf32>
    %101 = arith.mulf %96, %100 : vector<1x8x8xf32>
    %102 = arith.truncf %101 : vector<1x8x8xf32> to vector<1x8x8xbf16>
    "tpu.trace_start"() <{level = 10 : i32, message = "bqk,bkd->bqd"}> : () -> ()
    %cst_30 = arith.constant dense<0.000000e+00> : vector<1x8x8xf32>
    %103 = tpu.matmul %102, %88, %cst_30 {dimension_numbers = #tpu.dot_dimension_numbers<[2], [1], [1], [2], [0, 0, 0, 1, 1, 2], [0], [0]>} : vector<1x8x8xbf16>, vector<1x8x8xbf16>, vector<1x8x8xf32> -> vector<1x8x8xf32>
    "tpu.trace_stop"() : () -> ()
    %104 = vector.shape_cast %103 : vector<1x8x8xf32> to vector<8x8xf32>
    %105 = arith.truncf %104 : vector<8x8xf32> to vector<8x8xbf16>
    %106 = vector.extract_strided_slice %14 {offsets = [16, 0], sizes = [8, 32], strides = [1, 1]} : vector<32x32xbf16> to vector<8x32xbf16>
    %cst_31 = arith.constant dense<0.000000e+00> : vector<8x32xf32>
    %107 = tpu.matmul %105, %106, %cst_31 {dimension_numbers = #tpu.dot_dimension_numbers<[1], [0], [0], [1], [0, 0, 1, 1], [], []>} : vector<8x8xbf16>, vector<8x32xbf16>, vector<8x32xf32> -> vector<8x32xf32>
    %108 = arith.addf %77, %107 : vector<8x32xf32>
    %109 = vector.extract_strided_slice %7 {offsets = [0, 24], sizes = [8, 8], strides = [1, 1]} : vector<8x96xf32> to vector<8x8xf32>
    %cst_32 = arith.constant 0.353553385 : f32
    %110 = vector.broadcast %cst_32 : f32 to vector<8x8xf32>
    %111 = arith.mulf %109, %110 : vector<8x8xf32>
    %112 = vector.shape_cast %111 : vector<8x8xf32> to vector<1x8x8xf32>
    %113 = arith.truncf %112 : vector<1x8x8xf32> to vector<1x8x8xbf16>
    %114 = vector.extract_strided_slice %7 {offsets = [0, 56], sizes = [8, 8], strides = [1, 1]} : vector<8x96xf32> to vector<8x8xf32>
    %115 = vector.shape_cast %114 : vector<8x8xf32> to vector<1x8x8xf32>
    %116 = arith.truncf %115 : vector<1x8x8xf32> to vector<1x8x8xbf16>
    %117 = vector.extract_strided_slice %7 {offsets = [0, 88], sizes = [8, 8], strides = [1, 1]} : vector<8x96xf32> to vector<8x8xf32>
    %118 = vector.shape_cast %117 : vector<8x8xf32> to vector<1x8x8xf32>
    %119 = arith.truncf %118 : vector<1x8x8xf32> to vector<1x8x8xbf16>
    "tpu.trace_start"() <{level = 10 : i32, message = "bqd,bkd->bqk"}> : () -> ()
    %cst_33 = arith.constant dense<0.000000e+00> : vector<1x8x8xf32>
    %120 = tpu.matmul %113, %116, %cst_33 {dimension_numbers = #tpu.dot_dimension_numbers<[2], [2], [1], [1], [0, 0, 0, 1, 1, 1], [0], [0]>} : vector<1x8x8xbf16>, vector<1x8x8xbf16>, vector<1x8x8xf32> -> vector<1x8x8xf32>
    "tpu.trace_stop"() : () -> ()
    %121 = vector.broadcast %13 : vector<1x1x8xf32> to vector<1x8x8xf32>
    %122 = arith.addf %120, %121 : vector<1x8x8xf32>
    %cst_34 = arith.constant dense<0xFF800000> : vector<1x8xf32>
    %123 = vector.multi_reduction <maximumf>, %122, %cst_34 [2] : vector<1x8x8xf32> to vector<1x8xf32>
    %124 = vector.shape_cast %123 : vector<1x8xf32> to vector<1x8x1xf32>
    %125 = vector.broadcast %124 : vector<1x8x1xf32> to vector<1x8x8xf32>
    %126 = arith.subf %122, %125 : vector<1x8x8xf32>
    %127 = math.exp %126 : vector<1x8x8xf32>
    %cst_35 = arith.constant dense<0.000000e+00> : vector<1x8xf32>
    %128 = vector.multi_reduction <add>, %127, %cst_35 [2] : vector<1x8x8xf32> to vector<1x8xf32>
    %129 = vector.shape_cast %128 : vector<1x8xf32> to vector<1x8x1xf32>
    %130 = tpu.reciprocal %129 {approx = true} : vector<1x8x1xf32> -> vector<1x8x1xf32>
    %131 = vector.broadcast %130 : vector<1x8x1xf32> to vector<1x8x8xf32>
    %132 = arith.mulf %127, %131 : vector<1x8x8xf32>
    %133 = arith.truncf %132 : vector<1x8x8xf32> to vector<1x8x8xbf16>
    "tpu.trace_start"() <{level = 10 : i32, message = "bqk,bkd->bqd"}> : () -> ()
    %cst_36 = arith.constant dense<0.000000e+00> : vector<1x8x8xf32>
    %134 = tpu.matmul %133, %119, %cst_36 {dimension_numbers = #tpu.dot_dimension_numbers<[2], [1], [1], [2], [0, 0, 0, 1, 1, 2], [0], [0]>} : vector<1x8x8xbf16>, vector<1x8x8xbf16>, vector<1x8x8xf32> -> vector<1x8x8xf32>
    "tpu.trace_stop"() : () -> ()
    %135 = vector.shape_cast %134 : vector<1x8x8xf32> to vector<8x8xf32>
    %136 = arith.truncf %135 : vector<8x8xf32> to vector<8x8xbf16>
    %137 = vector.extract_strided_slice %14 {offsets = [24, 0], sizes = [8, 32], strides = [1, 1]} : vector<32x32xbf16> to vector<8x32xbf16>
    %cst_37 = arith.constant dense<0.000000e+00> : vector<8x32xf32>
    %138 = tpu.matmul %136, %137, %cst_37 {dimension_numbers = #tpu.dot_dimension_numbers<[1], [0], [0], [1], [0, 0, 1, 1], [], []>} : vector<8x8xbf16>, vector<8x32xbf16>, vector<8x32xf32> -> vector<8x32xf32>
    %139 = arith.addf %108, %138 : vector<8x32xf32>
    %c0_38 = arith.constant 0 : index
    %c0_39 = arith.constant 0 : index
    %140 = vector.load %arg6[%c0_38, %c0_39] : memref<1x32xf32, #tpu.memory_space<vmem>>, vector<1x32xf32>
    %141 = vector.broadcast %140 : vector<1x32xf32> to vector<8x32xf32>
    %142 = arith.addf %139, %141 : vector<8x32xf32>
    %143 = arith.addf %142, %1 : vector<8x32xf32>
    %c0_40 = arith.constant 0 : index
    %c0_41 = arith.constant 0 : index
    %144 = vector.load %arg7[%c0_40, %c0_41] : memref<1x32xf32, #tpu.memory_space<vmem>>, vector<1x32xf32>
    %c0_42 = arith.constant 0 : index
    %c0_43 = arith.constant 0 : index
    %145 = vector.load %arg8[%c0_42, %c0_43] : memref<1x32xf32, #tpu.memory_space<vmem>>, vector<1x32xf32>
    %cst_44 = arith.constant dense<0.000000e+00> : vector<8xf32>
    %146 = vector.multi_reduction <add>, %143, %cst_44 [1] : vector<8x32xf32> to vector<8xf32>
    %147 = vector.shape_cast %146 : vector<8xf32> to vector<8x1xf32>
    %cst_45 = arith.constant 3.200000e+01 : f32
    %148 = vector.broadcast %cst_45 : f32 to vector<8x1xf32>
    %149 = arith.divf %147, %148 : vector<8x1xf32>
    %150 = vector.broadcast %149 : vector<8x1xf32> to vector<8x32xf32>
    %151 = arith.subf %143, %150 : vector<8x32xf32>
    %152 = arith.mulf %151, %151 : vector<8x32xf32>
    %cst_46 = arith.constant dense<0.000000e+00> : vector<8xf32>
    %153 = vector.multi_reduction <add>, %152, %cst_46 [1] : vector<8x32xf32> to vector<8xf32>
    %154 = vector.shape_cast %153 : vector<8xf32> to vector<8x1xf32>
    %cst_47 = arith.constant 3.200000e+01 : f32
    %155 = vector.broadcast %cst_47 : f32 to vector<8x1xf32>
    %156 = arith.divf %154, %155 : vector<8x1xf32>
    %cst_48 = arith.constant 9.99999974E-6 : f32
    %157 = vector.broadcast %cst_48 : f32 to vector<8x1xf32>
    %158 = arith.addf %156, %157 : vector<8x1xf32>
    %159 = math.rsqrt %158 : vector<8x1xf32>
    %160 = vector.broadcast %159 : vector<8x1xf32> to vector<8x32xf32>
    %161 = arith.mulf %151, %160 : vector<8x32xf32>
    %162 = vector.broadcast %144 : vector<1x32xf32> to vector<8x32xf32>
    %163 = arith.mulf %161, %162 : vector<8x32xf32>
    %164 = vector.broadcast %145 : vector<1x32xf32> to vector<8x32xf32>
    %165 = arith.addf %163, %164 : vector<8x32xf32>
    %166 = arith.truncf %165 : vector<8x32xf32> to vector<8x32xbf16>
    %c0_49 = arith.constant 0 : index
    %c0_50 = arith.constant 0 : index
    %167 = vector.load %arg9[%c0_49, %c0_50] : memref<32x64xbf16, #tpu.memory_space<vmem>>, vector<32x64xbf16>
    %cst_51 = arith.constant dense<0.000000e+00> : vector<8x64xf32>
    %168 = tpu.matmul %166, %167, %cst_51 {dimension_numbers = #tpu.dot_dimension_numbers<[1], [0], [0], [1], [0, 0, 1, 1], [], []>} : vector<8x32xbf16>, vector<32x64xbf16>, vector<8x64xf32> -> vector<8x64xf32>
    %c0_52 = arith.constant 0 : index
    %c0_53 = arith.constant 0 : index
    %169 = vector.load %arg10[%c0_52, %c0_53] : memref<1x64xf32, #tpu.memory_space<vmem>>, vector<1x64xf32>
    %170 = vector.broadcast %169 : vector<1x64xf32> to vector<8x64xf32>
    %171 = arith.addf %168, %170 : vector<8x64xf32>
    %cst_54 = arith.constant 0.000000e+00 : f32
    %172 = vector.broadcast %cst_54 : f32 to vector<8x64xf32>
    %173 = arith.maximumf %171, %172 : vector<8x64xf32>
    %174 = arith.truncf %173 : vector<8x64xf32> to vector<8x64xbf16>
    %c0_55 = arith.constant 0 : index
    %c0_56 = arith.constant 0 : index
    %175 = vector.load %arg11[%c0_55, %c0_56] : memref<64x32xbf16, #tpu.memory_space<vmem>>, vector<64x32xbf16>
    %cst_57 = arith.constant dense<0.000000e+00> : vector<8x32xf32>
    %176 = tpu.matmul %174, %175, %cst_57 {dimension_numbers = #tpu.dot_dimension_numbers<[1], [0], [0], [1], [0, 0, 1, 1], [], []>} : vector<8x64xbf16>, vector<64x32xbf16>, vector<8x32xf32> -> vector<8x32xf32>
    %c0_58 = arith.constant 0 : index
    %c0_59 = arith.constant 0 : index
    %177 = vector.load %arg12[%c0_58, %c0_59] : memref<1x32xf32, #tpu.memory_space<vmem>>, vector<1x32xf32>
    %178 = vector.broadcast %177 : vector<1x32xf32> to vector<8x32xf32>
    %179 = arith.addf %176, %178 : vector<8x32xf32>
    %180 = arith.addf %165, %179 : vector<8x32xf32>
    %c0_60 = arith.constant 0 : index
    %c0_61 = arith.constant 0 : index
    %181 = vector.load %arg13[%c0_60, %c0_61] : memref<1x32xf32, #tpu.memory_space<vmem>>, vector<1x32xf32>
    %c0_62 = arith.constant 0 : index
    %c0_63 = arith.constant 0 : index
    %182 = vector.load %arg14[%c0_62, %c0_63] : memref<1x32xf32, #tpu.memory_space<vmem>>, vector<1x32xf32>
    %cst_64 = arith.constant dense<0.000000e+00> : vector<8xf32>
    %183 = vector.multi_reduction <add>, %180, %cst_64 [1] : vector<8x32xf32> to vector<8xf32>
    %184 = vector.shape_cast %183 : vector<8xf32> to vector<8x1xf32>
    %cst_65 = arith.constant 3.200000e+01 : f32
    %185 = vector.broadcast %cst_65 : f32 to vector<8x1xf32>
    %186 = arith.divf %184, %185 : vector<8x1xf32>
    %187 = vector.broadcast %186 : vector<8x1xf32> to vector<8x32xf32>
    %188 = arith.subf %180, %187 : vector<8x32xf32>
    %189 = arith.mulf %188, %188 : vector<8x32xf32>
    %cst_66 = arith.constant dense<0.000000e+00> : vector<8xf32>
    %190 = vector.multi_reduction <add>, %189, %cst_66 [1] : vector<8x32xf32> to vector<8xf32>
    %191 = vector.shape_cast %190 : vector<8xf32> to vector<8x1xf32>
    %cst_67 = arith.constant 3.200000e+01 : f32
    %192 = vector.broadcast %cst_67 : f32 to vector<8x1xf32>
    %193 = arith.divf %191, %192 : vector<8x1xf32>
    %cst_68 = arith.constant 9.99999974E-6 : f32
    %194 = vector.broadcast %cst_68 : f32 to vector<8x1xf32>
    %195 = arith.addf %193, %194 : vector<8x1xf32>
    %196 = math.rsqrt %195 : vector<8x1xf32>
    %197 = vector.broadcast %196 : vector<8x1xf32> to vector<8x32xf32>
    %198 = arith.mulf %188, %197 : vector<8x32xf32>
    %199 = vector.broadcast %181 : vector<1x32xf32> to vector<8x32xf32>
    %200 = arith.mulf %198, %199 : vector<8x32xf32>
    %201 = vector.broadcast %182 : vector<1x32xf32> to vector<8x32xf32>
    %202 = arith.addf %200, %201 : vector<8x32xf32>
    %203 = vector.shape_cast %202 : vector<8x32xf32> to vector<1x8x32xf32>
    %c0_69 = arith.constant 0 : index
    %c0_70 = arith.constant 0 : index
    %c0_71 = arith.constant 0 : index
    %204 = vector.load %arg15[%c0_69, %c0_70, %c0_71] : memref<1x8x32xf32, #tpu.memory_space<vmem>>, vector<1x8x32xf32>
    tpu.vector_store %arg15[%c0_69, %c0_70, %c0_71], %203 {strides = array<i32>} : memref<1x8x32xf32, #tpu.memory_space<vmem>>, vector<1x8x32xf32>,
    return
  }
  func.func @transform_0(%arg0: i32) -> (i32, i32, i32) {
    %c0_i32 = arith.constant 0 : i32
    %c0_i32_0 = arith.constant 0 : i32
    %c0_i32_1 = arith.constant 0 : i32
    return %arg0, %c0_i32, %c0_i32_0 : i32, i32, i32
  }
  func.func @transform_1(%arg0: i32) -> (i32, i32, i32) {
    %c0_i32 = arith.constant 0 : i32
    %c0_i32_0 = arith.constant 0 : i32
    %c0_i32_1 = arith.constant 0 : i32
    return %arg0, %c0_i32, %c0_i32_0 : i32, i32, i32
  }
  func.func @transform_2(%arg0: i32) -> (i32, i32) {
    %c0_i32 = arith.constant 0 : i32
    %c0_i32_0 = arith.constant 0 : i32
    %c0_i32_1 = arith.constant 0 : i32
    return %c0_i32, %c0_i32_0 : i32, i32
  }
  func.func @transform_3(%arg0: i32) -> (i32, i32) {
    %c0_i32 = arith.constant 0 : i32
    %c0_i32_0 = arith.constant 0 : i32
    %c0_i32_1 = arith.constant 0 : i32
    return %c0_i32, %c0_i32_0 : i32, i32
  }
  func.func @transform_4(%arg0: i32) -> (i32, i32) {
    %c0_i32 = arith.constant 0 : i32
    %c0_i32_0 = arith.constant 0 : i32
    %c0_i32_1 = arith.constant 0 : i32
    return %c0_i32, %c0_i32_0 : i32, i32
  }
  func.func @transform_5(%arg0: i32) -> (i32, i32) {
    %c0_i32 = arith.constant 0 : i32
    %c0_i32_0 = arith.constant 0 : i32
    %c0_i32_1 = arith.constant 0 : i32
    return %c0_i32, %c0_i32_0 : i32, i32
  }
  func.func @transform_6(%arg0: i32) -> (i32, i32) {
    %c0_i32 = arith.constant 0 : i32
    %c0_i32_0 = arith.constant 0 : i32
    %c0_i32_1 = arith.constant 0 : i32
    return %c0_i32, %c0_i32_0 : i32, i32
  }
  func.func @transform_7(%arg0: i32) -> (i32, i32) {
    %c0_i32 = arith.constant 0 : i32
    %c0_i32_0 = arith.constant 0 : i32
    %c0_i32_1 = arith.constant 0 : i32
    return %c0_i32, %c0_i32_0 : i32, i32
  }
  func.func @transform_8(%arg0: i32) -> (i32, i32) {
    %c0_i32 = arith.constant 0 : i32
    %c0_i32_0 = arith.constant 0 : i32
    %c0_i32_1 = arith.constant 0 : i32
    return %c0_i32, %c0_i32_0 : i32, i32
  }
  func.func @transform_9(%arg0: i32) -> (i32, i32) {
    %c0_i32 = arith.constant 0 : i32
    %c0_i32_0 = arith.constant 0 : i32
    %c0_i32_1 = arith.constant 0 : i32
    return %c0_i32, %c0_i32_0 : i32, i32
  }
  func.func @transform_10(%arg0: i32) -> (i32, i32) {
    %c0_i32 = arith.constant 0 : i32
    %c0_i32_0 = arith.constant 0 : i32
    %c0_i32_1 = arith.constant 0 : i32
    return %c0_i32, %c0_i32_0 : i32, i32
  }
  func.func @transform_11(%arg0: i32) -> (i32, i32) {
    %c0_i32 = arith.constant 0 : i32
    %c0_i32_0 = arith.constant 0 : i32
    %c0_i32_1 = arith.constant 0 : i32
    return %c0_i32, %c0_i32_0 : i32, i32
  }
  func.func @transform_12(%arg0: i32) -> (i32, i32) {
    %c0_i32 = arith.constant 0 : i32
    %c0_i32_0 = arith.constant 0 : i32
    %c0_i32_1 = arith.constant 0 : i32
    return %c0_i32, %c0_i32_0 : i32, i32
  }
  func.func @transform_13(%arg0: i32) -> (i32, i32) {
    %c0_i32 = arith.constant 0 : i32
    %c0_i32_0 = arith.constant 0 : i32
    %c0_i32_1 = arith.constant 0 : i32
    return %c0_i32, %c0_i32_0 : i32, i32
  }
  func.func @transform_14(%arg0: i32) -> (i32, i32, i32) {
    %c0_i32 = arith.constant 0 : i32
    %c0_i32_0 = arith.constant 0 : i32
    %c0_i32_1 = arith.constant 0 : i32
    return %arg0, %c0_i32, %c0_i32_0 : i32, i32, i32
  }
}

</mosaic_0001>

<bundles_post_ra>
// kernel: tpu_custom_call.1
= control target key start
LH: loop header
LB: loop body
LE: loop exit
PB: predicated region body
PF: predicated region fallthrough
CT: control target
= control target key end

     0   :  { %s1814_s0 = inlined_call_operand.hbm [shape: s32[2,1,8], index: 0, kind: input, shape index: {}]   ;;  %s1815_s1 = inlined_call_operand.vmem [shape: f32[2,8,32], index: 1, kind: input, shape index: {}]   ;;  %s1816_s2 = inlined_call_operand.vmem [shape: bf16[32,96], index: 2, kind: input, shape index: {}]   ;;  %s1817_s3 = inlined_call_operand.vmem [shape: f32[1,96], index: 3, kind: input, shape index: {}]   ;;  %s1818_s4 = inlined_call_operand.vmem [shape: bf16[32,32], index: 4, kind: input, shape index: {}]   ;;  %s1819_s5 = inlined_call_operand.vmem [shape: f32[1,32], index: 5, kind: input, shape index: {}]   ;;  %s1820_s6 = inlined_call_operand.vmem [shape: f32[1,32], index: 6, kind: input, shape index: {}]   ;;  %s1821_s7 = inlined_call_operand.vmem [shape: f32[1,32], index: 7, kind: input, shape index: {}]   ;;  %s1822_s8 = inlined_call_operand.hbm [shape: bf16[32,64], index: 8, kind: input, shape index: {}]   ;;  %s1823_s9 = inlined_call_operand.vmem [shape: f32[1,64], index: 9, kind: input, shape index: {}]   ;;  %s1824_s10 = inlined_call_operand.vmem [shape: bf16[64,32], index: 10, kind: input, shape index: {}]   ;;  %s1825_s11 = inlined_call_operand.vmem [shape: f32[1,32], index: 11, kind: input, shape index: {}]   ;;  %s1826_s12 = inlined_call_operand.vmem [shape: f32[1,32], index: 12, kind: input, shape index: {}]   ;;  %s1827_s13 = inlined_call_operand.vmem [shape: f32[1,32], index: 13, kind: input, shape index: {}]   ;;  %s1828_s14 = inlined_call_operand.hbm [shape: f32[2,8,32], index: 14, kind: output, shape index: {}]  }
   0x1   :  { %1834 = sst [smem:[#allocation16_spill]] %s1822_s8 }
   0x2   :  { %1835 = sst [smem:[#allocation17_spill]] %s1827_s13 }
   0x3   :  { %19 = vsyncpa [#allocation3], 0 }
   0x4   :  { %21 = vsyncpa [#allocation3 + $0x1], 0 }
   0x5   :  { %22 = vsyncpa [#allocation6], 0 }
   0x6   :  { %23 = vsyncpa [#allocation4], 0 }
   0x7   :  { %25 = vsyncpa [#allocation4 + $0x1], 0  ;;  %s1547_s29 = smov 0   ;;  %s1549_s30 = smov 0  }
   0x8   :  { %s1551_s15 = smov 0   ;;  %s1553_s16 = smov 0  }
   0x9 LB: > { %1836 = sst [smem:[#allocation11_spill]] %s1442_s29  ;;  %s1571_s20 = sadd.s32 4294967295, %s1454_s16   ;;  %s1454_s16 = sphi %s1553_s16, %s1851_s16   ;;  %s1450_s15 = sphi %s1551_s15, %s1853_s15   ;;  %s1446_s30 = sphi %s1549_s30, %s1855_s30   ;;  %s1442_s29 = sphi %s1547_s29, %s1854_s29  }
   0xa   : > { %1837 = sst [smem:[#allocation12_spill]] %s1450_s15  ;;  %p1156_p0 = scmp.ge.s32.totalorder %s1454_s16, 1 }
   0xb   : > { %1838 = sst [smem:[#allocation13_spill]] %s1454_s16  ;;  %p52_p1 = scmp.eq.s32.totalorder %s1571_s20, 0 }
   0xc   : > { %s1839_s8 = sld [smem:[#allocation16_spill]]  ;;  %p366_p2 = scmp.lt.s32.totalorder %s1454_s16, 3 }
   0xd   : > { %s1456_s22 = smov [#allocation5]   ;;  %s1457_s24 = smov 64  }
   0xe   : > { %p1576_p3 = pnand %p1156_p0, %p366_p2  ;;  %s397_s23 = sshll.u32 %s1456_s22, 4  ;;  %s398_s23 = int_to_ptr.vmem [resolvable:$true] %s397_s23 }
   0xf   : > { %s1458_s25 = smov 4   ;;  %s1155_s26 = sadd.s32 4294967294, %s1454_s16  }
  0x10   : > { %p1230_p4 = pneg %p1576_p3  ;;  %s1587_s27 = sadd.s32 1, %s1454_s16  }
  0x11   : > { %1841 = sst [smem:[#allocation14_spill]] %s1587_s27  ;;  %s38_s28 = sadd.s32 1, %s1450_s15 }
  0x12   : > { %s395_s19 = sshll.u32 %s1839_s8, 4  ;;  %p1231_p6 = pnand %p1230_p4, %p52_p1  ;;  %s396_s19 = int_to_ptr.hbm [resolvable:$true] %s395_s19 }
  0x13   : > { %s35_s17 = ssub.s32 %s1454_s16, %s1587_s27  ;;  %p45_p7 = scmp.ne.s32.totalorder %s1450_s15, %s1446_s30 }
  0x14   : > { %1233 = dma.hbm_to_vmem [thread:$0]  (!%p1231_p6), %s396_s19, 256, %s398_s23, [#allocation6], %s1457_s24, %s1457_s24, %s1458_s25  }
  0x15   : > { %p36_p8 = scmp.eq.s32.totalorder %s35_s17, 0  ;;  %p46_p9 = scmp.eq.s32.totalorder %s1454_s16, 0 }
  0x16   : > { %p51_p10 = scmp.ne.s32.totalorder %s1446_s30, %s1442_s29  ;;  %p353_p11 = scmp.eq.s32.totalorder %s1571_s20, 1 }
  0x17   : > { %s1599_s18 = scalar_select %p36_p8, %s1450_s15, %s38_s28  }
  0x18   : > { %p1603_p12 = por %p52_p1, %p51_p10  ;;  %p1607_p13 = por %p353_p11, %p45_p7 }
  0x19   : > { %1842 = sst [smem:[#allocation15_spill]] %s1599_s18  ;;  %p359_p0 = scmp.eq.s32.totalorder %s1155_s26, 1 }
  0x1a   : > { %p47_p2 = por %p46_p9, %p45_p7  ;;  %s426_s23 = sand.u32 1, %s1450_s15  }
  0x1b   : > { %p1612_p4 = por %p359_p0, %p51_p10  ;;  %p1243_p6 = scmp.lt.s32.totalorder %s1454_s16, 2 }
  0x1c   : > { %s432_s17 = scalar_lea.hbm %s1814_s0, %s1454_s16  ;;  %s429_s18 = scalar_lea.vmem [#allocation2], %s426_s23 }
  0x1d   : > { %s434_s8 = sshll.u32 %s432_s17, 4  ;;  %s436_s27 = sshll.u32 %s429_s18, 4  ;;  %s435_s8 = int_to_ptr.hbm [resolvable:$true] %s434_s8  ;;  %s437_s27 = int_to_ptr.vmem [resolvable:$true] %s436_s27 }
  0x1e   : > { %p1621_p8 = pnand %p1243_p6, %p47_p2  ;;  %s427_s26 = scalar_lea.sflag [#allocation3], %s426_s23 }
  0x1f   : > { %s1354_s15 = sshra.s32 %s435_s8, 4  ;;  %s1361_s18 = scalar_lea.hbm %s1814_s0, 2  ;;  %s1355_s15 = int_to_ptr.hbm [resolvable:$true] %s1354_s15 }
  0x20   : > { %s1356_s13 = scalar_lea.hbm %s1355_s15, 1  ;;  %p1358_p9 = pneg %p1621_p8 }
  0x21   : > { %p1357_p7 = scmp.ne.s32.totalorder %s1355_s15, %s1356_s13  ;;  %p1362_p0 = scmp.lt.s32.totalorder %s1355_s15, %s1814_s0 }
  0x22   : > { %p1363_p2 = scmp.lt.s32.totalorder %s1361_s18, %s1356_s13 }
  0x23   : > { %p1359_p10 = pnand %p1358_p9, %p1357_p7 }
  0x24   : > { %p1364_p6 = por %p1363_p2, %p1362_p0 }
  0x25   : > { %p1360_p11 = pneg %p1359_p10 }
  0x27   : > { %p1365_p5 = pnand %p1364_p6, %p1360_p11 }
  0x29   : > { %1368 = shalt.err (!%p1365_p5)
}
  0x2a   : > { %1237 = dma.hbm_to_vmem [thread:$0]  (!%p1621_p8), %s435_s8, 16, %s437_s27, %s427_s26  }
  0x2b   : > { %452 = sbr.rel (%p1576_p3) target bundleno = 2327 (0x917), region = 76  ;;  %s1638_s23 = sand.u32 (!%p1576_p3), 1, %s1446_s30  }
  0x2c   : > { %s455_s25 = scalar_lea.sflag (!%p1576_p3), [#allocation3], %s1638_s23  ;;  %s457_s28 = scalar_lea.vmem (!%p1576_p3), [#allocation2], %s1638_s23 }
  0x30   : > { %1429 = dma.done.wait (%p1603_p12), %s455_s25, 16  }
  0x31   : > { %1431 = vsyncadd (%p1603_p12), %s455_s25, 4294967280 }
  0x32   : > { %1433 = dma.done.wait (%p52_p1), [#allocation6], 256  }
  0x33   : > { %1435 = vsyncadd (%p52_p1), [#allocation6], 4294967040  ;;  %p511_p3 = scmp.lt.s32.totalorder %s1571_s20, 1  ;;  %v1215_v0 = vld [vmem:[%s1816_s2 + $0x8] sm:$0xff]  ;;  %v1214_v1 = vld [vmem:[%s1816_s2] sm:$0xff]  ;;  %vm538_vm0 = vcmask 261120  }
  0x34   : > { %548 = vmatpush.bf16.msra.mxu0 %v1215_v0  ;;  %v1294_v4 = vld [vmem:[%s1817_s3] ss:$0 sm:$0xff]  ;;  %s1459_s25 = smov 88   ;;  %s1462_s29 = smov 80   ;;  %vm573_vm1 = vcmask 64512   ;;  %vm610_vm2 = vcmask 1043456  }
  0x35   : > { %s512_s8 = scalar_select %p511_p3, %s1571_s20, 1  ;;  %v558_v20 = vld [vmem:[%s1818_s4] sm:$0xf]  ;;  %v1465_v28 = vmov 0.0   ;;  %vm1000_vm8 = vcmask 523264  }
  0x36   : > { %s1463_s15 = smov 72   ;;  %v711_v23 = vsel %vm610_vm2, %v558_v20, 0  ;;  %v555_v27 = vld [vmem:[%s457_s28] sm:$0x1]  ;;  %s1466_s28 = smov 56  }
  0x37   : > { %s1162_s13 = sshll.u32 %s512_s8, 3  ;;  %s1460_s8 = smov 96   ;;  %vm556_vm3 = vcmp.ne.s32.totalorder %v555_v27, 0 }
  0x38   : > { %s514_s16 = scalar_lea.vmem %s1815_s1, %s1162_s13  ;;  %549 = vmatpush.bf16.msra.mxu0 %v1214_v1  ;;  %s1461_s13 = smov 120   ;;  %v557_v29 = vsel %vm556_vm3, -1e+09, %v1465_v28 }
  0x39   : > { %v1661_v2 = vld [vmem:[%s514_s16] sm:$0xff]  ;;  %s1464_s16 = smov 112   ;;  %v1692_v30 = vperm.slane %v557_v29, 0  ;;  %s1467_s22 = smov 40  }
  0x3a   : > { %v517_v3 = vpack.c.bf16 %v1661_v2, %v1661_v2  ;;  %s1468_s26 = smov 64   ;;  %s1469_s18 = smov 104  }
  0x3b   : > { %s1211_s17 = sshll.u32 %s1571_s20, 3  ;;  %s1847_s27 = sld [smem:[#allocation17_spill]] }
  0x3c   : > { %1171 = vmatmul.msk.bf16.vlgmr.msra.gmra.mxu0 %vm538_vm0, %v517_v3 }
  0xb9   : > { %v551_v5 = vpop.f32.mrf.mxu0 }
  0xba   : > { %v552_v6 = vadd.f32 %v1294_v4, %v551_v5  ;;  %v559_v5 = vld [vmem:[%s1818_s4 + $0x4] sm:$0xf] }
  0xbc   : > { %v562_v7 = vmul.f32 0.35355338, %v552_v6  ;;  %v564_v8 = vpack.c.bf16 %v552_v6, %v552_v6  ;;  %v692_v6 = vsel %vm610_vm2, %v559_v5, 0 }
  0xbd   : > { %701 = vmatpush.bf16.msrb.mxu0 %v692_v6 }
  0xbe   : > { %v569_v9 = vunpack.c.l.b16 %v564_v8  ;;  %v563_v10 = vpack.c.bf16 %v562_v7, %v562_v7 }
  0xc0   : > { %v1669_v11 = vpack.c.b16 %v569_v9, %v569_v9  ;;  %v629_v13 = vunpack.c.l.b16 %v563_v10 }
  0xc1   : > { %v553_v12 = vpop.f32.mrf.mxu0 }
  0xc2   : > { %633 = vrot.lane.b32.xlu2 %v1669_v11, %s1459_s25  ;;  %571 = vrot.lane.b32.xlu0 %v1669_v11, %s1460_s8  ;;  %v1673_v14 = vpack.c.b16 %v629_v13, %v629_v13  ;;  %s1470_s8 = smov 48  }
  0xca   : > { %631 = vrot.lane.b32.xlu2 %v1673_v14, %s1461_s13 }
  0xd2   : > { %728 = vrot.lane.b32.xlu2 %v1669_v11, %s1462_s29 }
  0xda   : > { %805 = vrot.lane.b32.xlu2 %v1669_v11, %s1463_s15  ;;  %s1062_s15 = scalar_lea.hbm %s1828_s14, %s1211_s17 }
  0xe2   : > { %726 = vrot.lane.b32.xlu2 %v1673_v14, %s1464_s16 }
 0x11c   : > { %v634_v15 = vpop.permute.xlu2 %633 }
 0x11d   : > { %v639_v16 = vsel %vm573_vm1, %v634_v15, 0 }
 0x11e   : > { %648 = vmatpush.bf16.xpose.msra.mxu3 %v639_v16 }
 0x124   : > { %v632_v17 = vpop.permute.xlu2 %631 }
 0x125   : > { %1174 = vmatmul.msk.bf16.vlgmr.msra.gmra.mxu3 %vm573_vm1, %v632_v17 }
 0x12c   : > { %v729_v18 = vpop.permute.xlu2 %728 }
 0x12d   : > { %v734_v19 = vsel %vm573_vm1, %v729_v18, 0 }
 0x12e   : > { %743 = vmatpush.bf16.xpose.msrb.mxu3 %v734_v19 }
 0x134   : > { %v572_v21 = vpop.permute.xlu0 %571  ;;  %v806_v22 = vpop.permute.xlu2 %805 }
 0x135   : > { %v578_v24 = vsel %vm573_vm1, %v572_v21, 0  ;;  %v811_v26 = vsel %vm573_vm1, %v806_v22, 0 }
 0x136   : > { %587 = vmatpush.bf16.xpose.msra.mxu1 %v578_v24 }
 0x13c   : > { %v727_v25 = vpop.permute.xlu2 %726 }
 0x13d   : > { %1172 = vmatmul.msk.bf16.vlgmr.msra.gmra.mxu1 %vm573_vm1, %v563_v10  ;;  %1178 = vmatmul.msk.bf16.vlgmr.msrb.gmra.mxu3 %vm573_vm1, %v727_v25 }
 0x13e   : > { %720 = vmatpush.bf16.msrb.mxu1 %v711_v23 }
 0x142   : > { %820 = vmatpush.bf16.xpose.msra.mxu1 %v811_v26 }
 0x1a8   : > { %v650_v31 = vpop.f32.mrf.mxu3 }
 0x1a9   : > { %v651_v32 = vadd.f32 %v650_v31, %v1692_v30 }
 0x1ab   : > { %v654_v33 = vsel %vm573_vm1, %v651_v32, -inf }
 0x1ac   : > { %655 = vmax.xlane.f32.xlu2 %v654_v33 }
 0x1b0   : > { %v652_v34 = vpop.f32.mrf.mxu3 }
 0x1ba   : > { %v589_v35 = vpop.f32.mrf.mxu1 }
 0x1bb   : > { %v590_v36 = vadd.f32 %v589_v35, %v1692_v30 }
 0x1bd   : > { %v593_v37 = vsel %vm573_vm1, %v590_v36, -inf }
 0x1be   : > { %594 = vmax.xlane.f32.xlu0 %v593_v37 }
 0x1c0   : > { %v745_v38 = vpop.f32.mrf.mxu3 }
 0x1c1   : > { %v1699_v39 = vadd.f32 %v745_v38, %v1692_v30 }
 0x1c2   : > { %v591_v40 = vpop.f32.mrf.mxu1 }
 0x1c3   : > { %v749_v41 = vsel %vm573_vm1, %v1699_v39, -inf }
 0x1c6   : > { %750 = vmax.xlane.f32.xlu0 %v749_v41 }
 0x1c8   : > { %v747_v42 = vpop.f32.mrf.mxu3 }
 0x21f   : > { %v656_v43 = vpop.xlane.xlu2 %655 }
 0x220   : > { %v657_v44 = vsub.f32 %v651_v32, %v656_v43 }
 0x222   : > { %v658_v45 = vmul.f32 1.442695, %v657_v44  ;;  %v560_v44 = vld [vmem:[%s1818_s4 + $0x8] sm:$0xf] }
 0x224   : > { %1302 = vpow2.f32 %v658_v45  ;;  %v787_v45 = vsel %vm610_vm2, %v560_v44, 0 }
 0x225   : > { %796 = vmatpush.bf16.msra.mxu0 %v787_v45 }
 0x22a   : > { %v1303_v46 = vpop.eup %1302 }
 0x22b   : > { %v660_v47 = vsel %vm573_vm1, %v1303_v46, 0.0 }
 0x22c   : > { %661 = vadd.xlane.f32.xlu0 %v660_v47 }
 0x231   : > { %v595_v48 = vpop.xlane.xlu0 %594 }
 0x232   : > { %v596_v49 = vsub.f32 %v590_v36, %v595_v48  ;;  %v561_v36 = vld [vmem:[%s1818_s4 + $0xc] sm:$0xf] }
 0x233   : > { %v864_v41 = vsel %vm610_vm2, %v561_v36, 0 }
 0x234   : > { %v597_v50 = vmul.f32 1.442695, %v596_v49 }
 0x236   : > { %1304 = vpow2.f32 %v597_v50 }
 0x239   : > { %v751_v53 = vpop.xlane.xlu0 %750 }
 0x23a   : > { %v752_v17 = vsub.f32 %v1699_v39, %v751_v53 }
 0x23c   : > { %v1305_v51 = vpop.eup %1304  ;;  %v753_v18 = vmul.f32 1.442695, %v752_v17 }
 0x23d   : > { %v599_v52 = vsel %vm573_vm1, %v1305_v51, 0.0 }
 0x23e   : > { %600 = vadd.xlane.f32.xlu1 %v599_v52 }
 0x240   : > { %666 = vrot.lane.b32.xlu0 %v1669_v11, %s1466_s28 }
 0x248   : > { %838 = vrot.lane.b32.xlu0 %v1669_v11, %s1467_s22  ;;  %s1066_s22 = sshll.u32 %s1062_s15, 4  ;;  %s1067_s22 = int_to_ptr.hbm [resolvable:$true] %s1066_s22 }
 0x249   : > { %s1398_s25 = sshra.s32 %s1067_s22, 4  ;;  %s1399_s25 = int_to_ptr.hbm [resolvable:$true] %s1398_s25 }
 0x24a   : > { %s1400_s17 = scalar_lea.hbm %s1399_s25, 8  ;;  %p1405_p8 = scmp.lt.s32.totalorder %s1399_s25, %s1828_s14 }
 0x24b   : > { %p1401_p1 = scmp.ne.s32.totalorder %s1399_s25, %s1400_s17 }
 0x24d   : > { %p1402_p5 = pnand %p1401_p1, %p1607_p13 }
 0x24f   : > { %p1403_p12 = pneg %p1402_p5 }
 0x257   : > { %605 = vrot.lane.b32.xlu1 %v1669_v11, %s1468_s26  ;;  %s1052_s26 = scalar_lea.sflag [#allocation4], %s1638_s23 }
 0x25f   : > { %803 = vrot.lane.b32.xlu1 %v1673_v14, %s1469_s18  ;;  %s1161_s18 = sshll.u32 %s1638_s23, 3 }
 0x260   : > { %s510_s20 = scalar_lea.vmem [#allocation7], %s1161_s18  ;;  %s1404_s18 = scalar_lea.hbm %s1828_s14, 16 }
 0x261   : > { %s1064_s28 = sshll.u32 %s510_s20, 4  ;;  %p1406_p7 = scmp.lt.s32.totalorder %s1404_s18, %s1400_s17  ;;  %s1065_s28 = int_to_ptr.vmem [resolvable:$true] %s1064_s28 }
 0x263   : > { %p1407_p9 = por %p1406_p7, %p1405_p8 }
 0x265   : > { %p1408_p10 = pnand %p1407_p9, %p1403_p12 }
 0x29f   : > { %v662_v54 = vpop.xlane.xlu0 %661 }
 0x2b1   : > { %v601_v58 = vpop.xlane.xlu1 %600 }
 0x2b2   : > { %v667_v55 = vpop.permute.xlu0 %666  ;;  %1306 = vrcp.f32 %v601_v58 }
 0x2b3   : > { %v672_v63 = vsel %vm610_vm2, %v667_v55, 0  ;;  %1308 = vrcp.f32 %v662_v54  ;;  %v1295_v54 = vld [vmem:[%s1819_s5] ss:$0 sm:$0xff] }
 0x2b4   : > { %1310 = vpow2.f32 %v753_v18 }
 0x2b8   : > { %v1307_v59 = vpop.eup %1306 }
 0x2b9   : > { %v603_v60 = vmul.f32 %v1307_v59, %v1305_v51  ;;  %v1309_v1 = vpop.eup %1308 }
 0x2ba   : > { %v839_v56 = vpop.permute.xlu0 %838  ;;  %v664_v3 = vmul.f32 %v1309_v1, %v1303_v46  ;;  %v1311_v24 = vpop.eup %1310 }
 0x2bb   : > { %v844_v57 = vsel %vm610_vm2, %v839_v56, 0  ;;  %v604_v0 = vpack.c.bf16 %v603_v60, %v603_v60  ;;  %v755_v27 = vsel %vm573_vm1, %v1311_v24, 0.0 }
 0x2bc   : > { %853 = vmatpush.bf16.msra.mxu3 %v844_v57  ;;  %v665_v4 = vpack.c.bf16 %v664_v3, %v664_v3 }
 0x2c9   : > { %v606_v61 = vpop.permute.xlu1 %605 }
 0x2ca   : > { %v612_v62 = vsel %vm610_vm2, %v606_v61, 0 }
 0x2cb   : > { %621 = vmatpush.bf16.msra.mxu2 %v612_v62  ;;  %v1471_v62 = vmov 32.0  }
 0x2ce   : > { %1173 = vmatmul.msk.bf16.vlgmr.msra.gmra.mxu2 %vm573_vm1, %v604_v0 }
 0x2cf   : > { %681 = vmatpush.bf16.msrb.mxu2 %v672_v63 }
 0x2d1   : > { %v804_v13 = vpop.permute.xlu1 %803 }
 0x2de   : > { %1175 = vmatmul.msk.bf16.vlgmr.msrb.gmra.mxu2 %vm573_vm1, %v665_v4 }
 0x351   : > { %v623_v7 = vpop.f32.mrf.mxu2 }
 0x352   : > { %v627_v8 = vpack.c.bf16 %v623_v7, %v623_v7 }
 0x354   : > { %1177 = vmatmul.msk.bf16.vlgmr.msrb.gmra.mxu1 %vm573_vm1, %v627_v8 }
 0x359   : > { %v625_v9 = vpop.f32.mrf.mxu2 }
 0x361   : > { %v683_v10 = vpop.f32.mrf.mxu2 }
 0x362   : > { %v687_v12 = vpack.c.bf16 %v683_v10, %v683_v10 }
 0x364   : > { %1176 = vmatmul.msk.bf16.vlgmr.msrb.gmra.mxu0 %vm573_vm1, %v687_v12  ;;  %1181 = vmatmul.msk.bf16.vlgmr.msra.gmra.mxu1 %vm573_vm1, %v804_v13  ;;  %v1216_v12 = vld [vmem:[#allocation5] sm:$0xff]  ;;  %v1221_v13 = vld [vmem:[%s1824_s10 + $0x18] sm:$0xff] }
 0x365   : > { %1008 = vmatpush.bf16.msrb.mxu1 %v1221_v13 }
 0x369   : > { %v685_v14 = vpop.f32.mrf.mxu2 }
 0x3d1   : > { %v722_v15 = vpop.f32.mrf.mxu1 }
 0x3d9   : > { %v724_v16 = vpop.f32.mrf.mxu1 }
 0x3da   : > { %v1220_v16 = vld [vmem:[%s1824_s10 + $0x10] sm:$0xff] }
 0x3db   : > { %1009 = vmatpush.bf16.msrb.mxu1 %v1220_v16 }
 0x3e1   : > { %v703_v19 = vpop.f32.mrf.mxu0  ;;  %v822_v20 = vpop.f32.mrf.mxu1 }
 0x3e2   : > { %v723_v21 = vadd.f32 %v722_v15, %v703_v19  ;;  %v823_v22 = vadd.f32 %v822_v20, %v1692_v30 }
 0x3e4   : > { %v826_v23 = vsel %vm573_vm1, %v823_v22, -inf }
 0x3e5   : > { %827 = vmax.xlane.f32.xlu1 %v826_v23 }
 0x3e9   : > { %v705_v25 = vpop.f32.mrf.mxu0  ;;  %v824_v26 = vpop.f32.mrf.mxu1 }
 0x3ea   : > { %v1297_v26 = vld [vmem:[%s1821_s7] ss:$0 sm:$0xff] }
 0x3ed   : > { %756 = vadd.xlane.f32.xlu1 %v755_v27 }
 0x458   : > { %v828_v28 = vpop.xlane.xlu1 %827 }
 0x459   : > { %v829_v29 = vsub.f32 %v823_v22, %v828_v28 }
 0x45b   : > { %v830_v31 = vmul.f32 1.442695, %v829_v29 }
 0x45d   : > { %1312 = vpow2.f32 %v830_v31 }
 0x460   : > { %v757_v30 = vpop.xlane.xlu1 %756 }
 0x461   : > { %1314 = vrcp.f32 %v757_v30  ;;  %v1298_v30 = vld [vmem:[%s1823_s9] ss:$0 sm:$0xff] }
 0x463   : > { %v1313_v32 = vpop.eup %1312 }
 0x464   : > { %v832_v33 = vsel %vm573_vm1, %v1313_v32, 0.0 }
 0x465   : > { %833 = vadd.xlane.f32.xlu2 %v832_v33  ;;  %v1218_v33 = vld [vmem:[%s1824_s10] sm:$0xff] }
 0x467   : > { %v1315_v35 = vpop.eup %1314 }
 0x468   : > { %v759_v38 = vmul.f32 %v1315_v35, %v1311_v24  ;;  %v1296_v24 = vld [vmem:[%s1820_s6] ss:$0 sm:$0xff] }
 0x47d   : > { %761 = vrot.lane.b32.xlu2 %v1669_v11, %s1470_s8  ;;  %v760_v11 = vpack.c.bf16 %v759_v38, %v759_v38 }
 0x4d8   : > { %v834_v34 = vpop.xlane.xlu2 %833 }
 0x4d9   : > { %1316 = vrcp.f32 %v834_v34 }
 0x4da   : > { %1318 = vrcp.f32 %v1471_v62 }
 0x4df   : > { %v1317_v37 = vpop.eup %1316 }
 0x4e0   : > { %v836_v39 = vmul.f32 %v1317_v37, %v1313_v32  ;;  %v762_v40 = vpop.permute.xlu2 %761  ;;  %v1319_v63 = vpop.eup %1318  ;;  %v1219_v32 = vld [vmem:[%s1824_s10 + $0x8] sm:$0xff] }
 0x4e1   : > { %v767_v42 = vsel %vm610_vm2, %v762_v40, 0  ;;  %v892_v0 = vmul.f32 32.0, %v1319_v63  ;;  %vm896_vm4 = vweird.f32 %v1319_v63  ;;  %1010 = vmatpush.bf16.msrb.mxu1 %v1219_v32 }
 0x4e2   : > { %v837_v43 = vpack.c.bf16 %v836_v39, %v836_v39  ;;  %776 = vmatpush.bf16.msra.mxu2 %v767_v42  ;;  %v1299_v39 = vld [vmem:[%s1825_s11] ss:$0 sm:$0xff] }
 0x4e3   : > { %v893_v1 = vsub.f32 1.0, %v892_v0 }
 0x4e4   : > { %1182 = vmatmul.msk.bf16.vlgmr.msra.gmra.mxu3 %vm573_vm1, %v837_v43 }
 0x4e5   : > { %1179 = vmatmul.msk.bf16.vlgmr.msra.gmra.mxu2 %vm573_vm1, %v760_v11  ;;  %v894_v3 = vmul.f32 %v1319_v63, %v893_v1  ;;  %1011 = vmatpush.bf16.msrb.mxu1 %v1218_v33 }
 0x4e6   : > { %873 = vmatpush.bf16.msrb.mxu2 %v864_v41 }
 0x4e7   : > { %v895_v4 = vadd.f32 %v1319_v63, %v894_v3 }
 0x4e9   : > { %v897_v5 = vsel %vm896_vm4, %v1319_v63, %v895_v4 }
 0x567   : > { %v855_v46 = vpop.f32.mrf.mxu3 }
 0x568   : > { %v859_v47 = vpack.c.bf16 %v855_v46, %v855_v46  ;;  %v778_v48 = vpop.f32.mrf.mxu2 }
 0x569   : > { %v782_v49 = vpack.c.bf16 %v778_v48, %v778_v48 }
 0x56a   : > { %1183 = vmatmul.msk.bf16.vlgmr.msrb.gmra.mxu2 %vm573_vm1, %v859_v47 }
 0x56b   : > { %1180 = vmatmul.msk.bf16.vlgmr.msra.gmra.mxu0 %vm573_vm1, %v782_v49 }
 0x56f   : > { %v857_v50 = vpop.f32.mrf.mxu3 }
 0x570   : > { %v780_v51 = vpop.f32.mrf.mxu2 }
 0x5e8   : > { %v798_v52 = vpop.f32.mrf.mxu0 }
 0x5e9   : > { %v802_v53 = vadd.f32 %v798_v52, %v723_v21 }
 0x5ed   : > { %v875_v55 = vpop.f32.mrf.mxu2 }
 0x5ee   : > { %v879_v56 = vadd.f32 %v875_v55, %v802_v53 }
 0x5f0   : > { %v884_v57 = vadd.f32 %v1295_v54, %v879_v56  ;;  %v800_v58 = vpop.f32.mrf.mxu0 }
 0x5f1   : > { %v1300_v58 = vld [vmem:[%s1826_s12] ss:$0 sm:$0xff] }
 0x5f2   : > { %v885_v59 = vadd.f32 %v884_v57, %v1661_v2  ;;  %v1217_v2 = vld [vmem:[#allocation5 + $0x8] sm:$0xff] }
 0x5f3   : > { %955 = vmatpush.bf16.msrb.mxu0 %v1217_v2 }
 0x5f4   : > { %v888_v60 = vsel %vm538_vm0, %v885_v59, 0.0 }
 0x5f5   : > { %889 = vadd.xlane.f32.xlu1 %v888_v60  ;;  %v877_v61 = vpop.f32.mrf.mxu2 }
 0x5f6   : > { %v1301_v61 = vld [vmem:[%s1847_s27] ss:$0 sm:$0xff] }
 0x5f7   : > { %956 = vmatpush.bf16.msrb.mxu0 %v1216_v12 }
 0x668   : > { %v890_v6 = vpop.xlane.xlu1 %889 }
 0x669   : > { %v898_v7 = vmul.f32 %v897_v5, %v890_v6 }
 0x66b   : > { %v899_v8 = vsub.f32 %v885_v59, %v898_v7 }
 0x66d   : > { %v900_v9 = vmul.f32 %v899_v8, %v899_v8 }
 0x66f   : > { %v901_v10 = vsel %vm538_vm0, %v900_v9, 0.0 }
 0x670   : > { %902 = vadd.xlane.f32.xlu0 %v901_v10 }
 0x6e3   : > { %v903_v14 = vpop.xlane.xlu0 %902 }
 0x6e4   : > { %v904_v15 = vmul.f32 %v903_v14, %v897_v5 }
 0x6e6   : > { %v905_v17 = vadd.f32 1e-05, %v904_v15 }
 0x6e8   : > { %1320 = vrsqrt.f32 %v905_v17  ;;  %vm912_vm6 = vweird.f32 %v905_v17 }
 0x6ee   : > { %v1321_v18 = vpop.eup %1320 }
 0x6ef   : > { %v907_v19 = vmul.f32 %v1321_v18, %v905_v17  ;;  %vm913_vm5 = vweird.f32 %v1321_v18 }
 0x6f0   : > { %vm914_vm7 = vmor %vm912_vm6, %vm913_vm5 }
 0x6f1   : > { %v908_v20 = vmul.f32 %v1321_v18, %v907_v19 }
 0x6f3   : > { %v909_v21 = vmul.f32 0.5, %v908_v20 }
 0x6f5   : > { %v910_v22 = vsub.f32 1.5, %v909_v21 }
 0x6f7   : > { %v911_v23 = vmul.f32 %v1321_v18, %v910_v22 }
 0x6f9   : > { %v915_v25 = vsel %vm914_vm7, %v1321_v18, %v911_v23 }
 0x6fa   : > { %v916_v27 = vmul.f32 %v915_v25, %v899_v8 }
 0x6fc   : > { %v920_v28 = vmul.f32 %v1296_v24, %v916_v27 }
 0x6fe   : > { %v924_v29 = vadd.f32 %v1297_v26, %v920_v28 }
 0x700   : > { %v925_v31 = vpack.c.bf16 %v924_v29, %v924_v29 }
 0x702   : > { %1192 = vmatmul.msk.bf16.vlgmr.msrb.gmra.mxu0 %vm538_vm0, %v925_v31 }
 0x77f   : > { %v958_v34 = vpop.f32.mrf.mxu0 }
 0x780   : > { %v959_v35 = vadd.f32 %v1298_v30, %v958_v34 }
 0x782   : > { %v962_v36 = vmax.f32 %v959_v35, 0.0 }
 0x784   : > { %v963_v37 = vpack.c.bf16 %v962_v36, %v962_v36 }
 0x786   : > { %1209 = vmatmul.msk.bf16.vlgmr.msrb.gmra.mxu1 %vm1000_vm8, %v963_v37 }
 0x787   : > { %v960_v38 = vpop.f32.mrf.mxu0 }
 0x803   : > { %v1013_v40 = vpop.f32.mrf.mxu1 }
 0x804   : > { %v1014_v41 = vadd.f32 %v1299_v39, %v1013_v40 }
 0x806   : > { %v1017_v42 = vadd.f32 %v1014_v41, %v924_v29 }
 0x808   : > { %v1020_v43 = vsel %vm538_vm0, %v1017_v42, 0.0 }
 0x809   : > { %1021 = vadd.xlane.f32.xlu1 %v1020_v43 }
 0x80b   : > { %v1015_v11 = vpop.f32.mrf.mxu1 }
 0x87c   : > { %v1022_v44 = vpop.xlane.xlu1 %1021 }
 0x87d   : > { %v1023_v45 = vmul.f32 %v1022_v44, %v897_v5 }
 0x87f   : > { %v1024_v46 = vsub.f32 %v1017_v42, %v1023_v45 }
 0x881   : > { %v1025_v47 = vmul.f32 %v1024_v46, %v1024_v46 }
 0x883   : > { %v1026_v48 = vsel %vm538_vm0, %v1025_v47, 0.0 }
 0x884   : > { %1027 = vadd.xlane.f32.xlu1 %v1026_v48 }
 0x8f7   : > { %v1028_v49 = vpop.xlane.xlu1 %1027 }
 0x8f8   : > { %v1029_v50 = vmul.f32 %v1028_v49, %v897_v5 }
 0x8fa   : > { %v1030_v51 = vadd.f32 1e-05, %v1029_v50 }
 0x8fc   : > { %1322 = vrsqrt.f32 %v1030_v51  ;;  %vm1037_vm10 = vweird.f32 %v1030_v51 }
 0x902   : > { %v1323_v52 = vpop.eup %1322 }
 0x903   : > { %v1032_v53 = vmul.f32 %v1323_v52, %v1030_v51  ;;  %vm1038_vm9 = vweird.f32 %v1323_v52 }
 0x904   : > { %vm1039_vm11 = vmor %vm1037_vm10, %vm1038_vm9 }
 0x905   : > { %v1033_v54 = vmul.f32 %v1323_v52, %v1032_v53 }
 0x907   : > { %v1034_v55 = vmul.f32 0.5, %v1033_v54 }
 0x909   : > { %v1035_v56 = vsub.f32 1.5, %v1034_v55 }
 0x90b   : > { %v1036_v57 = vmul.f32 %v1323_v52, %v1035_v56 }
 0x90d   : > { %v1040_v59 = vsel %vm1039_vm11, %v1323_v52, %v1036_v57 }
 0x90e   : > { %v1041_v60 = vmul.f32 %v1040_v59, %v1024_v46 }
 0x910   : > { %v1045_v62 = vmul.f32 %v1300_v58, %v1041_v60 }
 0x912   : > { %v1049_v63 = vadd.f32 %v1301_v61, %v1045_v62 }
 0x914   : > { %1050 = vst.msk [vmem:[%s510_s20] sm:$0xff] %vm538_vm0, %v1049_v63 }
 0x915   : > { %1411 = shalt.err (!%p1408_p10)
}
 0x916   : > { %1228 = dma.vmem_to_hbm [thread:$0]  (%p1607_p13), %s1065_s28, 128, %s1067_s22, %s1052_s26  }
 0x917 PF: > { %s1848_s23 = sld [smem:[#allocation11_spill]] }
 0x918   : > { %s1849_s16 = sld [smem:[#allocation13_spill]] }
 0x91d   : > { %s1078_s21 = sand.u32 1, %s1848_s23  }
 0x91e   : > { %p1850_p11 = scmp.ge.s32.totalorder %s1849_s16, 2  ;;  %s1079_s27 = scalar_lea.sflag [#allocation4], %s1078_s21 }
 0x920   : > { %p1239_p0 = pnand %p1850_p11, %p1612_p4 }
 0x922   : > { %p1240_p2 = pneg %p1239_p0 }
 0x924   : > { %1437 = dma.done.wait (%p1240_p2), %s1079_s27, 128  }
 0x925   : > { %1439 = vsyncadd (%p1240_p2), %s1079_s27, 4294967168  ;;  %s1851_s16 = sld [smem:[#allocation14_spill]]  ;;  %s1854_s29 = smov %s1446_s30 }
 0x926   : > { %s1852_s20 = sld [smem:[#allocation12_spill]] }
 0x927   : > { %s1853_s15 = sld [smem:[#allocation15_spill]] }
 0x92b   : > { %p28_p6 = scmp.ge.s32.totalorder %s1851_s16, 4  }
 0x92c   : > { %s1855_s30 = smov %s1852_s20 }
 0x92d   :  { %30 = sbr.rel (!%p28_p6) target bundleno = 9 (0x9), region = 128 }
 0x932   :  { %1085 = vsyncpa [#allocation3], 1 }
 0x933   :  { %1087 = vsyncpa [#allocation3 + $0x1], 1 }
 0x934   :  { %1088 = vsyncpa [#allocation6], 1 }
 0x935   :  { %1089 = vsyncpa [#allocation4], 1 }
 0x936   :  { %1091 = vsyncpa [#allocation4 + $0x1], 1 }

// kernel: tpu_custom_call.1
= control target key start
LH: loop header
LB: loop body
LE: loop exit
PB: predicated region body
PF: predicated region fallthrough
CT: control target
= control target key end

     0   :  { %s1814_s0 = inlined_call_operand.hbm [shape: s32[2,1,8], index: 0, kind: input, shape index: {}]   ;;  %s1815_s1 = inlined_call_operand.vmem [shape: f32[2,8,32], index: 1, kind: input, shape index: {}]   ;;  %s1816_s2 = inlined_call_operand.vmem [shape: bf16[32,96], index: 2, kind: input, shape index: {}]   ;;  %s1817_s3 = inlined_call_operand.vmem [shape: f32[1,96], index: 3, kind: input, shape index: {}]   ;;  %s1818_s4 = inlined_call_operand.vmem [shape: bf16[32,32], index: 4, kind: input, shape index: {}]   ;;  %s1819_s5 = inlined_call_operand.vmem [shape: f32[1,32], index: 5, kind: input, shape index: {}]   ;;  %s1820_s6 = inlined_call_operand.vmem [shape: f32[1,32], index: 6, kind: input, shape index: {}]   ;;  %s1821_s7 = inlined_call_operand.vmem [shape: f32[1,32], index: 7, kind: input, shape index: {}]   ;;  %s1822_s8 = inlined_call_operand.hbm [shape: bf16[32,64], index: 8, kind: input, shape index: {}]   ;;  %s1823_s9 = inlined_call_operand.vmem [shape: f32[1,64], index: 9, kind: input, shape index: {}]   ;;  %s1824_s10 = inlined_call_operand.vmem [shape: bf16[64,32], index: 10, kind: input, shape index: {}]   ;;  %s1825_s11 = inlined_call_operand.vmem [shape: f32[1,32], index: 11, kind: input, shape index: {}]   ;;  %s1826_s12 = inlined_call_operand.vmem [shape: f32[1,32], index: 12, kind: input, shape index: {}]   ;;  %s1827_s13 = inlined_call_operand.vmem [shape: f32[1,32], index: 13, kind: input, shape index: {}]   ;;  %s1828_s14 = inlined_call_operand.hbm [shape: f32[2,8,32], index: 14, kind: output, shape index: {}]  }
   0x1   :  { %1834 = sst [smem:[#allocation16_spill]] %s1822_s8 }
   0x2   :  { %1835 = sst [smem:[#allocation17_spill]] %s1827_s13 }
   0x3   :  { %19 = vsyncpa [#allocation3], 0 }
   0x4   :  { %21 = vsyncpa [#allocation3 + $0x1], 0 }
   0x5   :  { %22 = vsyncpa [#allocation6], 0 }
   0x6   :  { %23 = vsyncpa [#allocation4], 0 }
   0x7   :  { %25 = vsyncpa [#allocation4 + $0x1], 0  ;;  %s1547_s29 = smov 0   ;;  %s1549_s30 = smov 0  }
   0x8   :  { %s1551_s15 = smov 0   ;;  %s1553_s16 = smov 0  }
   0x9 LB: > { %1836 = sst [smem:[#allocation11_spill]] %s1442_s29  ;;  %s1571_s20 = sadd.s32 4294967295, %s1454_s16   ;;  %s1454_s16 = sphi %s1553_s16, %s1851_s16   ;;  %s1450_s15 = sphi %s1551_s15, %s1853_s15   ;;  %s1446_s30 = sphi %s1549_s30, %s1855_s30   ;;  %s1442_s29 = sphi %s1547_s29, %s1854_s29  }
   0xa   : > { %1837 = sst [smem:[#allocation12_spill]] %s1450_s15  ;;  %p1156_p0 = scmp.ge.s32.totalorder %s1454_s16, 1 }
   0xb   : > { %1838 = sst [smem:[#allocation13_spill]] %s1454_s16  ;;  %p52_p1 = scmp.eq.s32.totalorder %s1571_s20, 0 }
   0xc   : > { %s1839_s8 = sld [smem:[#allocation16_spill]]  ;;  %p366_p2 = scmp.lt.s32.totalorder %s1454_s16, 3 }
   0xd   : > { %s1456_s22 = smov [#allocation5]   ;;  %s1457_s24 = smov 64  }
   0xe   : > { %p1576_p3 = pnand %p1156_p0, %p366_p2  ;;  %s397_s23 = sshll.u32 %s1456_s22, 4  ;;  %s398_s23 = int_to_ptr.vmem [resolvable:$true] %s397_s23 }
   0xf   : > { %s1458_s25 = smov 4   ;;  %s1155_s26 = sadd.s32 4294967294, %s1454_s16  }
  0x10   : > { %p1230_p4 = pneg %p1576_p3  ;;  %s1587_s27 = sadd.s32 1, %s1454_s16  }
  0x11   : > { %1841 = sst [smem:[#allocation14_spill]] %s1587_s27  ;;  %s38_s28 = sadd.s32 1, %s1450_s15 }
  0x12   : > { %s395_s19 = sshll.u32 %s1839_s8, 4  ;;  %p1231_p6 = pnand %p1230_p4, %p52_p1  ;;  %s396_s19 = int_to_ptr.hbm [resolvable:$true] %s395_s19 }
  0x13   : > { %s35_s17 = ssub.s32 %s1454_s16, %s1587_s27  ;;  %p45_p7 = scmp.ne.s32.totalorder %s1450_s15, %s1446_s30 }
  0x14   : > { %1233 = dma.hbm_to_vmem [thread:$0]  (!%p1231_p6), %s396_s19, 256, %s398_s23, [#allocation6], %s1457_s24, %s1457_s24, %s1458_s25  }
  0x15   : > { %p36_p8 = scmp.eq.s32.totalorder %s35_s17, 0  ;;  %p46_p9 = scmp.eq.s32.totalorder %s1454_s16, 0 }
  0x16   : > { %p51_p10 = scmp.ne.s32.totalorder %s1446_s30, %s1442_s29  ;;  %p353_p11 = scmp.eq.s32.totalorder %s1571_s20, 1 }
  0x17   : > { %s1599_s18 = scalar_select %p36_p8, %s1450_s15, %s38_s28  }
  0x18   : > { %p1603_p12 = por %p52_p1, %p51_p10  ;;  %p1607_p13 = por %p353_p11, %p45_p7 }
  0x19   : > { %1842 = sst [smem:[#allocation15_spill]] %s1599_s18  ;;  %p359_p0 = scmp.eq.s32.totalorder %s1155_s26, 1 }
  0x1a   : > { %p47_p2 = por %p46_p9, %p45_p7  ;;  %s426_s23 = sand.u32 1, %s1450_s15  }
  0x1b   : > { %p1612_p4 = por %p359_p0, %p51_p10  ;;  %p1243_p6 = scmp.lt.s32.totalorder %s1454_s16, 2 }
  0x1c   : > { %s432_s17 = scalar_lea.hbm %s1814_s0, %s1454_s16  ;;  %s429_s18 = scalar_lea.vmem [#allocation2], %s426_s23 }
  0x1d   : > { %s434_s8 = sshll.u32 %s432_s17, 4  ;;  %s436_s27 = sshll.u32 %s429_s18, 4  ;;  %s435_s8 = int_to_ptr.hbm [resolvable:$true] %s434_s8  ;;  %s437_s27 = int_to_ptr.vmem [resolvable:$true] %s436_s27 }
  0x1e   : > { %p1621_p8 = pnand %p1243_p6, %p47_p2  ;;  %s427_s26 = scalar_lea.sflag [#allocation3], %s426_s23 }
  0x1f   : > { %s1354_s15 = sshra.s32 %s435_s8, 4  ;;  %s1361_s18 = scalar_lea.hbm %s1814_s0, 2  ;;  %s1355_s15 = int_to_ptr.hbm [resolvable:$true] %s1354_s15 }
  0x20   : > { %s1356_s13 = scalar_lea.hbm %s1355_s15, 1  ;;  %p1358_p9 = pneg %p1621_p8 }
  0x21   : > { %p1357_p7 = scmp.ne.s32.totalorder %s1355_s15, %s1356_s13  ;;  %p1362_p0 = scmp.lt.s32.totalorder %s1355_s15, %s1814_s0 }
  0x22   : > { %p1363_p2 = scmp.lt.s32.totalorder %s1361_s18, %s1356_s13 }
  0x23   : > { %p1359_p10 = pnand %p1358_p9, %p1357_p7 }
  0x24   : > { %p1364_p6 = por %p1363_p2, %p1362_p0 }
  0x25   : > { %p1360_p11 = pneg %p1359_p10 }
  0x27   : > { %p1365_p5 = pnand %p1364_p6, %p1360_p11 }
  0x29   : > { %1368 = shalt.err (!%p1365_p5)
}
  0x2a   : > { %1237 = dma.hbm_to_vmem [thread:$0]  (!%p1621_p8), %s435_s8, 16, %s437_s27, %s427_s26  }
  0x2b   : > { %452 = sbr.rel (%p1576_p3) target bundleno = 2327 (0x917), region = 76  ;;  %s1638_s23 = sand.u32 (!%p1576_p3), 1, %s1446_s30  }
  0x2c   : > { %s455_s25 = scalar_lea.sflag (!%p1576_p3), [#allocation3], %s1638_s23  ;;  %s457_s28 = scalar_lea.vmem (!%p1576_p3), [#allocation2], %s1638_s23 }
  0x30   : > { %1429 = dma.done.wait (%p1603_p12), %s455_s25, 16  }
  0x31   : > { %1431 = vsyncadd (%p1603_p12), %s455_s25, 4294967280 }
  0x32   : > { %1433 = dma.done.wait (%p52_p1), [#allocation6], 256  }
  0x33   : > { %1435 = vsyncadd (%p52_p1), [#allocation6], 4294967040  ;;  %p511_p3 = scmp.lt.s32.totalorder %s1571_s20, 1  ;;  %v1215_v0 = vld [vmem:[%s1816_s2 + $0x8] sm:$0xff]  ;;  %v1214_v1 = vld [vmem:[%s1816_s2] sm:$0xff]  ;;  %vm538_vm0 = vcmask 261120  }
  0x34   : > { %548 = vmatpush.bf16.msra.mxu0 %v1215_v0  ;;  %v1294_v4 = vld [vmem:[%s1817_s3] ss:$0 sm:$0xff]  ;;  %s1459_s25 = smov 88   ;;  %s1462_s29 = smov 80   ;;  %vm573_vm1 = vcmask 64512   ;;  %vm610_vm2 = vcmask 1043456  }
  0x35   : > { %s512_s8 = scalar_select %p511_p3, %s1571_s20, 1  ;;  %v558_v20 = vld [vmem:[%s1818_s4] sm:$0xf]  ;;  %v1465_v28 = vmov 0.0   ;;  %vm1000_vm8 = vcmask 523264  }
  0x36   : > { %s1463_s15 = smov 72   ;;  %v711_v23 = vsel %vm610_vm2, %v558_v20, 0  ;;  %v555_v27 = vld [vmem:[%s457_s28] sm:$0x1]  ;;  %s1466_s28 = smov 56  }
  0x37   : > { %s1162_s13 = sshll.u32 %s512_s8, 3  ;;  %s1460_s8 = smov 96   ;;  %vm556_vm3 = vcmp.ne.s32.totalorder %v555_v27, 0 }
  0x38   : > { %s514_s16 = scalar_lea.vmem %s1815_s1, %s1162_s13  ;;  %549 = vmatpush.bf16.msra.mxu0 %v1214_v1  ;;  %s1461_s13 = smov 120   ;;  %v557_v29 = vsel %vm556_vm3, -1e+09, %v1465_v28 }
  0x39   : > { %v1661_v2 = vld [vmem:[%s514_s16] sm:$0xff]  ;;  %s1464_s16 = smov 112   ;;  %v1692_v30 = vperm.slane %v557_v29, 0  ;;  %s1467_s22 = smov 40  }
  0x3a   : > { %v517_v3 = vpack.c.bf16 %v1661_v2, %v1661_v2  ;;  %s1468_s26 = smov 64   ;;  %s1469_s18 = smov 104  }
  0x3b   : > { %s1211_s17 = sshll.u32 %s1571_s20, 3  ;;  %s1847_s27 = sld [smem:[#allocation17_spill]] }
  0x3c   : > { %1171 = vmatmul.msk.bf16.vlgmr.msra.gmra.mxu0 %vm538_vm0, %v517_v3 }
  0xb9   : > { %v551_v5 = vpop.f32.mrf.mxu0 }
  0xba   : > { %v552_v6 = vadd.f32 %v1294_v4, %v551_v5  ;;  %v559_v5 = vld [vmem:[%s1818_s4 + $0x4] sm:$0xf] }
  0xbc   : > { %v562_v7 = vmul.f32 0.35355338, %v552_v6  ;;  %v564_v8 = vpack.c.bf16 %v552_v6, %v552_v6  ;;  %v692_v6 = vsel %vm610_vm2, %v559_v5, 0 }
  0xbd   : > { %701 = vmatpush.bf16.msrb.mxu0 %v692_v6 }
  0xbe   : > { %v569_v9 = vunpack.c.l.b16 %v564_v8  ;;  %v563_v10 = vpack.c.bf16 %v562_v7, %v562_v7 }
  0xc0   : > { %v1669_v11 = vpack.c.b16 %v569_v9, %v569_v9  ;;  %v629_v13 = vunpack.c.l.b16 %v563_v10 }
  0xc1   : > { %v553_v12 = vpop.f32.mrf.mxu0 }
  0xc2   : > { %633 = vrot.lane.b32.xlu2 %v1669_v11, %s1459_s25  ;;  %571 = vrot.lane.b32.xlu0 %v1669_v11, %s1460_s8  ;;  %v1673_v14 = vpack.c.b16 %v629_v13, %v629_v13  ;;  %s1470_s8 = smov 48  }
  0xca   : > { %631 = vrot.lane.b32.xlu2 %v1673_v14, %s1461_s13 }
  0xd2   : > { %728 = vrot.lane.b32.xlu2 %v1669_v11, %s1462_s29 }
  0xda   : > { %805 = vrot.lane.b32.xlu2 %v1669_v11, %s1463_s15  ;;  %s1062_s15 = scalar_lea.hbm %s1828_s14, %s1211_s17 }
  0xe2   : > { %726 = vrot.lane.b32.xlu2 %v1673_v14, %s1464_s16 }
 0x11c   : > { %v634_v15 = vpop.permute.xlu2 %633 }
 0x11d   : > { %v639_v16 = vsel %vm573_vm1, %v634_v15, 0 }
 0x11e   : > { %648 = vmatpush.bf16.xpose.msra.mxu3 %v639_v16 }
 0x124   : > { %v632_v17 = vpop.permute.xlu2 %631 }
 0x125   : > { %1174 = vmatmul.msk.bf16.vlgmr.msra.gmra.mxu3 %vm573_vm1, %v632_v17 }
 0x12c   : > { %v729_v18 = vpop.permute.xlu2 %728 }
 0x12d   : > { %v734_v19 = vsel %vm573_vm1, %v729_v18, 0 }
 0x12e   : > { %743 = vmatpush.bf16.xpose.msrb.mxu3 %v734_v19 }
 0x134   : > { %v572_v21 = vpop.permute.xlu0 %571  ;;  %v806_v22 = vpop.permute.xlu2 %805 }
 0x135   : > { %v578_v24 = vsel %vm573_vm1, %v572_v21, 0  ;;  %v811_v26 = vsel %vm573_vm1, %v806_v22, 0 }
 0x136   : > { %587 = vmatpush.bf16.xpose.msra.mxu1 %v578_v24 }
 0x13c   : > { %v727_v25 = vpop.permute.xlu2 %726 }
 0x13d   : > { %1172 = vmatmul.msk.bf16.vlgmr.msra.gmra.mxu1 %vm573_vm1, %v563_v10  ;;  %1178 = vmatmul.msk.bf16.vlgmr.msrb.gmra.mxu3 %vm573_vm1, %v727_v25 }
 0x13e   : > { %720 = vmatpush.bf16.msrb.mxu1 %v711_v23 }
 0x142   : > { %820 = vmatpush.bf16.xpose.msra.mxu1 %v811_v26 }
 0x1a8   : > { %v650_v31 = vpop.f32.mrf.mxu3 }
 0x1a9   : > { %v651_v32 = vadd.f32 %v650_v31, %v1692_v30 }
 0x1ab   : > { %v654_v33 = vsel %vm573_vm1, %v651_v32, -inf }
 0x1ac   : > { %655 = vmax.xlane.f32.xlu2 %v654_v33 }
 0x1b0   : > { %v652_v34 = vpop.f32.mrf.mxu3 }
 0x1ba   : > { %v589_v35 = vpop.f32.mrf.mxu1 }
 0x1bb   : > { %v590_v36 = vadd.f32 %v589_v35, %v1692_v30 }
 0x1bd   : > { %v593_v37 = vsel %vm573_vm1, %v590_v36, -inf }
 0x1be   : > { %594 = vmax.xlane.f32.xlu0 %v593_v37 }
 0x1c0   : > { %v745_v38 = vpop.f32.mrf.mxu3 }
 0x1c1   : > { %v1699_v39 = vadd.f32 %v745_v38, %v1692_v30 }
 0x1c2   : > { %v591_v40 = vpop.f32.mrf.mxu1 }
 0x1c3   : > { %v749_v41 = vsel %vm573_vm1, %v1699_v39, -inf }
 0x1c6   : > { %750 = vmax.xlane.f32.xlu0 %v749_v41 }
 0x1c8   : > { %v747_v42 = vpop.f32.mrf.mxu3 }
 0x21f   : > { %v656_v43 = vpop.xlane.xlu2 %655 }
 0x220   : > { %v657_v44 = vsub.f32 %v651_v32, %v656_v43 }
 0x222   : > { %v658_v45 = vmul.f32 1.442695, %v657_v44  ;;  %v560_v44 = vld [vmem:[%s1818_s4 + $0x8] sm:$0xf] }
 0x224   : > { %1302 = vpow2.f32 %v658_v45  ;;  %v787_v45 = vsel %vm610_vm2, %v560_v44, 0 }
 0x225   : > { %796 = vmatpush.bf16.msra.mxu0 %v787_v45 }
 0x22a   : > { %v1303_v46 = vpop.eup %1302 }
 0x22b   : > { %v660_v47 = vsel %vm573_vm1, %v1303_v46, 0.0 }
 0x22c   : > { %661 = vadd.xlane.f32.xlu0 %v660_v47 }
 0x231   : > { %v595_v48 = vpop.xlane.xlu0 %594 }
 0x232   : > { %v596_v49 = vsub.f32 %v590_v36, %v595_v48  ;;  %v561_v36 = vld [vmem:[%s1818_s4 + $0xc] sm:$0xf] }
 0x233   : > { %v864_v41 = vsel %vm610_vm2, %v561_v36, 0 }
 0x234   : > { %v597_v50 = vmul.f32 1.442695, %v596_v49 }
 0x236   : > { %1304 = vpow2.f32 %v597_v50 }
 0x239   : > { %v751_v53 = vpop.xlane.xlu0 %750 }
 0x23a   : > { %v752_v17 = vsub.f32 %v1699_v39, %v751_v53 }
 0x23c   : > { %v1305_v51 = vpop.eup %1304  ;;  %v753_v18 = vmul.f32 1.442695, %v752_v17 }
 0x23d   : > { %v599_v52 = vsel %vm573_vm1, %v1305_v51, 0.0 }
 0x23e   : > { %600 = vadd.xlane.f32.xlu1 %v599_v52 }
 0x240   : > { %666 = vrot.lane.b32.xlu0 %v1669_v11, %s1466_s28 }
 0x248   : > { %838 = vrot.lane.b32.xlu0 %v1669_v11, %s1467_s22  ;;  %s1066_s22 = sshll.u32 %s1062_s15, 4  ;;  %s1067_s22 = int_to_ptr.hbm [resolvable:$true] %s1066_s22 }
 0x249   : > { %s1398_s25 = sshra.s32 %s1067_s22, 4  ;;  %s1399_s25 = int_to_ptr.hbm [resolvable:$true] %s1398_s25 }
 0x24a   : > { %s1400_s17 = scalar_lea.hbm %s1399_s25, 8  ;;  %p1405_p8 = scmp.lt.s32.totalorder %s1399_s25, %s1828_s14 }
 0x24b   : > { %p1401_p1 = scmp.ne.s32.totalorder %s1399_s25, %s1400_s17 }
 0x24d   : > { %p1402_p5 = pnand %p1401_p1, %p1607_p13 }
 0x24f   : > { %p1403_p12 = pneg %p1402_p5 }
 0x257   : > { %605 = vrot.lane.b32.xlu1 %v1669_v11, %s1468_s26  ;;  %s1052_s26 = scalar_lea.sflag [#allocation4], %s1638_s23 }
 0x25f   : > { %803 = vrot.lane.b32.xlu1 %v1673_v14, %s1469_s18  ;;  %s1161_s18 = sshll.u32 %s1638_s23, 3 }
 0x260   : > { %s510_s20 = scalar_lea.vmem [#allocation7], %s1161_s18  ;;  %s1404_s18 = scalar_lea.hbm %s1828_s14, 16 }
 0x261   : > { %s1064_s28 = sshll.u32 %s510_s20, 4  ;;  %p1406_p7 = scmp.lt.s32.totalorder %s1404_s18, %s1400_s17  ;;  %s1065_s28 = int_to_ptr.vmem [resolvable:$true] %s1064_s28 }
 0x263   : > { %p1407_p9 = por %p1406_p7, %p1405_p8 }
 0x265   : > { %p1408_p10 = pnand %p1407_p9, %p1403_p12 }
 0x29f   : > { %v662_v54 = vpop.xlane.xlu0 %661 }
 0x2b1   : > { %v601_v58 = vpop.xlane.xlu1 %600 }
 0x2b2   : > { %v667_v55 = vpop.permute.xlu0 %666  ;;  %1306 = vrcp.f32 %v601_v58 }
 0x2b3   : > { %v672_v63 = vsel %vm610_vm2, %v667_v55, 0  ;;  %1308 = vrcp.f32 %v662_v54  ;;  %v1295_v54 = vld [vmem:[%s1819_s5] ss:$0 sm:$0xff] }
 0x2b4   : > { %1310 = vpow2.f32 %v753_v18 }
 0x2b8   : > { %v1307_v59 = vpop.eup %1306 }
 0x2b9   : > { %v603_v60 = vmul.f32 %v1307_v59, %v1305_v51  ;;  %v1309_v1 = vpop.eup %1308 }
 0x2ba   : > { %v839_v56 = vpop.permute.xlu0 %838  ;;  %v664_v3 = vmul.f32 %v1309_v1, %v1303_v46  ;;  %v1311_v24 = vpop.eup %1310 }
 0x2bb   : > { %v844_v57 = vsel %vm610_vm2, %v839_v56, 0  ;;  %v604_v0 = vpack.c.bf16 %v603_v60, %v603_v60  ;;  %v755_v27 = vsel %vm573_vm1, %v1311_v24, 0.0 }
 0x2bc   : > { %853 = vmatpush.bf16.msra.mxu3 %v844_v57  ;;  %v665_v4 = vpack.c.bf16 %v664_v3, %v664_v3 }
 0x2c9   : > { %v606_v61 = vpop.permute.xlu1 %605 }
 0x2ca   : > { %v612_v62 = vsel %vm610_vm2, %v606_v61, 0 }
 0x2cb   : > { %621 = vmatpush.bf16.msra.mxu2 %v612_v62  ;;  %v1471_v62 = vmov 32.0  }
 0x2ce   : > { %1173 = vmatmul.msk.bf16.vlgmr.msra.gmra.mxu2 %vm573_vm1, %v604_v0 }
 0x2cf   : > { %681 = vmatpush.bf16.msrb.mxu2 %v672_v63 }
 0x2d1   : > { %v804_v13 = vpop.permute.xlu1 %803 }
 0x2de   : > { %1175 = vmatmul.msk.bf16.vlgmr.msrb.gmra.mxu2 %vm573_vm1, %v665_v4 }
 0x351   : > { %v623_v7 = vpop.f32.mrf.mxu2 }
 0x352   : > { %v627_v8 = vpack.c.bf16 %v623_v7, %v623_v7 }
 0x354   : > { %1177 = vmatmul.msk.bf16.vlgmr.msrb.gmra.mxu1 %vm573_vm1, %v627_v8 }
 0x359   : > { %v625_v9 = vpop.f32.mrf.mxu2 }
 0x361   : > { %v683_v10 = vpop.f32.mrf.mxu2 }
 0x362   : > { %v687_v12 = vpack.c.bf16 %v683_v10, %v683_v10 }
 0x364   : > { %1176 = vmatmul.msk.bf16.vlgmr.msrb.gmra.mxu0 %vm573_vm1, %v687_v12  ;;  %1181 = vmatmul.msk.bf16.vlgmr.msra.gmra.mxu1 %vm573_vm1, %v804_v13  ;;  %v1216_v12 = vld [vmem:[#allocation5] sm:$0xff]  ;;  %v1221_v13 = vld [vmem:[%s1824_s10 + $0x18] sm:$0xff] }
 0x365   : > { %1008 = vmatpush.bf16.msrb.mxu1 %v1221_v13 }
 0x369   : > { %v685_v14 = vpop.f32.mrf.mxu2 }
 0x3d1   : > { %v722_v15 = vpop.f32.mrf.mxu1 }
 0x3d9   : > { %v724_v16 = vpop.f32.mrf.mxu1 }
 0x3da   : > { %v1220_v16 = vld [vmem:[%s1824_s10 + $0x10] sm:$0xff] }
 0x3db   : > { %1009 = vmatpush.bf16.msrb.mxu1 %v1220_v16 }
 0x3e1   : > { %v703_v19 = vpop.f32.mrf.mxu0  ;;  %v822_v20 = vpop.f32.mrf.mxu1 }
 0x3e2   : > { %v723_v21 = vadd.f32 %v722_v15, %v703_v19  ;;  %v823_v22 = vadd.f32 %v822_v20, %v1692_v30 }
 0x3e4   : > { %v826_v23 = vsel %vm573_vm1, %v823_v22, -inf }
 0x3e5   : > { %827 = vmax.xlane.f32.xlu1 %v826_v23 }
 0x3e9   : > { %v705_v25 = vpop.f32.mrf.mxu0  ;;  %v824_v26 = vpop.f32.mrf.mxu1 }
 0x3ea   : > { %v1297_v26 = vld [vmem:[%s1821_s7] ss:$0 sm:$0xff] }
 0x3ed   : > { %756 = vadd.xlane.f32.xlu1 %v755_v27 }
 0x458   : > { %v828_v28 = vpop.xlane.xlu1 %827 }
 0x459   : > { %v829_v29 = vsub.f32 %v823_v22, %v828_v28 }
 0x45b   : > { %v830_v31 = vmul.f32 1.442695, %v829_v29 }
 0x45d   : > { %1312 = vpow2.f32 %v830_v31 }
 0x460   : > { %v757_v30 = vpop.xlane.xlu1 %756 }
 0x461   : > { %1314 = vrcp.f32 %v757_v30  ;;  %v1298_v30 = vld [vmem:[%s1823_s9] ss:$0 sm:$0xff] }
 0x463   : > { %v1313_v32 = vpop.eup %1312 }
 0x464   : > { %v832_v33 = vsel %vm573_vm1, %v1313_v32, 0.0 }
 0x465   : > { %833 = vadd.xlane.f32.xlu2 %v832_v33  ;;  %v1218_v33 = vld [vmem:[%s1824_s10] sm:$0xff] }
 0x467   : > { %v1315_v35 = vpop.eup %1314 }
 0x468   : > { %v759_v38 = vmul.f32 %v1315_v35, %v1311_v24  ;;  %v1296_v24 = vld [vmem:[%s1820_s6] ss:$0 sm:$0xff] }
 0x47d   : > { %761 = vrot.lane.b32.xlu2 %v1669_v11, %s1470_s8  ;;  %v760_v11 = vpack.c.bf16 %v759_v38, %v759_v38 }
 0x4d8   : > { %v834_v34 = vpop.xlane.xlu2 %833 }
 0x4d9   : > { %1316 = vrcp.f32 %v834_v34 }
 0x4da   : > { %1318 = vrcp.f32 %v1471_v62 }
 0x4df   : > { %v1317_v37 = vpop.eup %1316 }
 0x4e0   : > { %v836_v39 = vmul.f32 %v1317_v37, %v1313_v32  ;;  %v762_v40 = vpop.permute.xlu2 %761  ;;  %v1319_v63 = vpop.eup %1318  ;;  %v1219_v32 = vld [vmem:[%s1824_s10 + $0x8] sm:$0xff] }
 0x4e1   : > { %v767_v42 = vsel %vm610_vm2, %v762_v40, 0  ;;  %v892_v0 = vmul.f32 32.0, %v1319_v63  ;;  %vm896_vm4 = vweird.f32 %v1319_v63  ;;  %1010 = vmatpush.bf16.msrb.mxu1 %v1219_v32 }
 0x4e2   : > { %v837_v43 = vpack.c.bf16 %v836_v39, %v836_v39  ;;  %776 = vmatpush.bf16.msra.mxu2 %v767_v42  ;;  %v1299_v39 = vld [vmem:[%s1825_s11] ss:$0 sm:$0xff] }
 0x4e3   : > { %v893_v1 = vsub.f32 1.0, %v892_v0 }
 0x4e4   : > { %1182 = vmatmul.msk.bf16.vlgmr.msra.gmra.mxu3 %vm573_vm1, %v837_v43 }
 0x4e5   : > { %1179 = vmatmul.msk.bf16.vlgmr.msra.gmra.mxu2 %vm573_vm1, %v760_v11  ;;  %v894_v3 = vmul.f32 %v1319_v63, %v893_v1  ;;  %1011 = vmatpush.bf16.msrb.mxu1 %v1218_v33 }
 0x4e6   : > { %873 = vmatpush.bf16.msrb.mxu2 %v864_v41 }
 0x4e7   : > { %v895_v4 = vadd.f32 %v1319_v63, %v894_v3 }
 0x4e9   : > { %v897_v5 = vsel %vm896_vm4, %v1319_v63, %v895_v4 }
 0x567   : > { %v855_v46 = vpop.f32.mrf.mxu3 }
 0x568   : > { %v859_v47 = vpack.c.bf16 %v855_v46, %v855_v46  ;;  %v778_v48 = vpop.f32.mrf.mxu2 }
 0x569   : > { %v782_v49 = vpack.c.bf16 %v778_v48, %v778_v48 }
 0x56a   : > { %1183 = vmatmul.msk.bf16.vlgmr.msrb.gmra.mxu2 %vm573_vm1, %v859_v47 }
 0x56b   : > { %1180 = vmatmul.msk.bf16.vlgmr.msra.gmra.mxu0 %vm573_vm1, %v782_v49 }
 0x56f   : > { %v857_v50 = vpop.f32.mrf.mxu3 }
 0x570   : > { %v780_v51 = vpop.f32.mrf.mxu2 }
 0x5e8   : > { %v798_v52 = vpop.f32.mrf.mxu0 }
 0x5e9   : > { %v802_v53 = vadd.f32 %v798_v52, %v723_v21 }
 0x5ed   : > { %v875_v55 = vpop.f32.mrf.mxu2 }
 0x5ee   : > { %v879_v56 = vadd.f32 %v875_v55, %v802_v53 }
 0x5f0   : > { %v884_v57 = vadd.f32 %v1295_v54, %v879_v56  ;;  %v800_v58 = vpop.f32.mrf.mxu0 }
 0x5f1   : > { %v1300_v58 = vld [vmem:[%s1826_s12] ss:$0 sm:$0xff] }
 0x5f2   : > { %v885_v59 = vadd.f32 %v884_v57, %v1661_v2  ;;  %v1217_v2 = vld [vmem:[#allocation5 + $0x8] sm:$0xff] }
 0x5f3   : > { %955 = vmatpush.bf16.msrb.mxu0 %v1217_v2 }
 0x5f4   : > { %v888_v60 = vsel %vm538_vm0, %v885_v59, 0.0 }
 0x5f5   : > { %889 = vadd.xlane.f32.xlu1 %v888_v60  ;;  %v877_v61 = vpop.f32.mrf.mxu2 }
 0x5f6   : > { %v1301_v61 = vld [vmem:[%s1847_s27] ss:$0 sm:$0xff] }
 0x5f7   : > { %956 = vmatpush.bf16.msrb.mxu0 %v1216_v12 }
 0x668   : > { %v890_v6 = vpop.xlane.xlu1 %889 }
 0x669   : > { %v898_v7 = vmul.f32 %v897_v5, %v890_v6 }
 0x66b   : > { %v899_v8 = vsub.f32 %v885_v59, %v898_v7 }
 0x66d   : > { %v900_v9 = vmul.f32 %v899_v8, %v899_v8 }
 0x66f   : > { %v901_v10 = vsel %vm538_vm0, %v900_v9, 0.0 }
 0x670   : > { %902 = vadd.xlane.f32.xlu0 %v901_v10 }
 0x6e3   : > { %v903_v14 = vpop.xlane.xlu0 %902 }
 0x6e4   : > { %v904_v15 = vmul.f32 %v903_v14, %v897_v5 }
 0x6e6   : > { %v905_v17 = vadd.f32 1e-05, %v904_v15 }
 0x6e8   : > { %1320 = vrsqrt.f32 %v905_v17  ;;  %vm912_vm6 = vweird.f32 %v905_v17 }
 0x6ee   : > { %v1321_v18 = vpop.eup %1320 }
 0x6ef   : > { %v907_v19 = vmul.f32 %v1321_v18, %v905_v17  ;;  %vm913_vm5 = vweird.f32 %v1321_v18 }
 0x6f0   : > { %vm914_vm7 = vmor %vm912_vm6, %vm913_vm5 }
 0x6f1   : > { %v908_v20 = vmul.f32 %v1321_v18, %v907_v19 }
 0x6f3   : > { %v909_v21 = vmul.f32 0.5, %v908_v20 }
 0x6f5   : > { %v910_v22 = vsub.f32 1.5, %v909_v21 }
 0x6f7   : > { %v911_v23 = vmul.f32 %v1321_v18, %v910_v22 }
 0x6f9   : > { %v915_v25 = vsel %vm914_vm7, %v1321_v18, %v911_v23 }
 0x6fa   : > { %v916_v27 = vmul.f32 %v915_v25, %v899_v8 }
 0x6fc   : > { %v920_v28 = vmul.f32 %v1296_v24, %v916_v27 }
 0x6fe   : > { %v924_v29 = vadd.f32 %v1297_v26, %v920_v28 }
 0x700   : > { %v925_v31 = vpack.c.bf16 %v924_v29, %v924_v29 }
 0x702   : > { %1192 = vmatmul.msk.bf16.vlgmr.msrb.gmra.mxu0 %vm538_vm0, %v925_v31 }
 0x77f   : > { %v958_v34 = vpop.f32.mrf.mxu0 }
 0x780   : > { %v959_v35 = vadd.f32 %v1298_v30, %v958_v34 }
 0x782   : > { %v962_v36 = vmax.f32 %v959_v35, 0.0 }
 0x784   : > { %v963_v37 = vpack.c.bf16 %v962_v36, %v962_v36 }
 0x786   : > { %1209 = vmatmul.msk.bf16.vlgmr.msrb.gmra.mxu1 %vm1000_vm8, %v963_v37 }
 0x787   : > { %v960_v38 = vpop.f32.mrf.mxu0 }
 0x803   : > { %v1013_v40 = vpop.f32.mrf.mxu1 }
 0x804   : > { %v1014_v41 = vadd.f32 %v1299_v39, %v1013_v40 }
 0x806   : > { %v1017_v42 = vadd.f32 %v1014_v41, %v924_v29 }
 0x808   : > { %v1020_v43 = vsel %vm538_vm0, %v1017_v42, 0.0 }
 0x809   : > { %1021 = vadd.xlane.f32.xlu1 %v1020_v43 }
 0x80b   : > { %v1015_v11 = vpop.f32.mrf.mxu1 }
 0x87c   : > { %v1022_v44 = vpop.xlane.xlu1 %1021 }
 0x87d   : > { %v1023_v45 = vmul.f32 %v1022_v44, %v897_v5 }
 0x87f   : > { %v1024_v46 = vsub.f32 %v1017_v42, %v1023_v45 }
 0x881   : > { %v1025_v47 = vmul.f32 %v1024_v46, %v1024_v46 }
 0x883   : > { %v1026_v48 = vsel %vm538_vm0, %v1025_v47, 0.0 }
 0x884   : > { %1027 = vadd.xlane.f32.xlu1 %v1026_v48 }
 0x8f7   : > { %v1028_v49 = vpop.xlane.xlu1 %1027 }
 0x8f8   : > { %v1029_v50 = vmul.f32 %v1028_v49, %v897_v5 }
 0x8fa   : > { %v1030_v51 = vadd.f32 1e-05, %v1029_v50 }
 0x8fc   : > { %1322 = vrsqrt.f32 %v1030_v51  ;;  %vm1037_vm10 = vweird.f32 %v1030_v51 }
 0x902   : > { %v1323_v52 = vpop.eup %1322 }
 0x903   : > { %v1032_v53 = vmul.f32 %v1323_v52, %v1030_v51  ;;  %vm1038_vm9 = vweird.f32 %v1323_v52 }
 0x904   : > { %vm1039_vm11 = vmor %vm1037_vm10, %vm1038_vm9 }
 0x905   : > { %v1033_v54 = vmul.f32 %v1323_v52, %v1032_v53 }
 0x907   : > { %v1034_v55 = vmul.f32 0.5, %v1033_v54 }
 0x909   : > { %v1035_v56 = vsub.f32 1.5, %v1034_v55 }
 0x90b   : > { %v1036_v57 = vmul.f32 %v1323_v52, %v1035_v56 }
 0x90d   : > { %v1040_v59 = vsel %vm1039_vm11, %v1323_v52, %v1036_v57 }
 0x90e   : > { %v1041_v60 = vmul.f32 %v1040_v59, %v1024_v46 }
 0x910   : > { %v1045_v62 = vmul.f32 %v1300_v58, %v1041_v60 }
 0x912   : > { %v1049_v63 = vadd.f32 %v1301_v61, %v1045_v62 }
 0x914   : > { %1050 = vst.msk [vmem:[%s510_s20] sm:$0xff] %vm538_vm0, %v1049_v63 }
 0x915   : > { %1411 = shalt.err (!%p1408_p10)
}
 0x916   : > { %1228 = dma.vmem_to_hbm [thread:$0]  (%p1607_p13), %s1065_s28, 128, %s1067_s22, %s1052_s26  }
 0x917 PF: > { %s1848_s23 = sld [smem:[#allocation11_spill]] }
 0x918   : > { %s1849_s16 = sld [smem:[#allocation13_spill]] }
 0x91d   : > { %s1078_s21 = sand.u32 1, %s1848_s23  }
 0x91e   : > { %p1850_p11 = scmp.ge.s32.totalorder %s1849_s16, 2  ;;  %s1079_s27 = scalar_lea.sflag [#allocation4], %s1078_s21 }
 0x920   : > { %p1239_p0 = pnand %p1850_p11, %p1612_p4 }
 0x922   : > { %p1240_p2 = pneg %p1239_p0 }
 0x924   : > { %1437 = dma.done.wait (%p1240_p2), %s1079_s27, 128  }
 0x925   : > { %1439 = vsyncadd (%p1240_p2), %s1079_s27, 4294967168  ;;  %s1851_s16 = sld [smem:[#allocation14_spill]]  ;;  %s1854_s29 = smov %s1446_s30 }
 0x926   : > { %s1852_s20 = sld [smem:[#allocation12_spill]] }
 0x927   : > { %s1853_s15 = sld [smem:[#allocation15_spill]] }
 0x92b   : > { %p28_p6 = scmp.ge.s32.totalorder %s1851_s16, 4  }
 0x92c   : > { %s1855_s30 = smov %s1852_s20 }
 0x92d   :  { %30 = sbr.rel (!%p28_p6) target bundleno = 9 (0x9), region = 128 }
 0x932   :  { %1085 = vsyncpa [#allocation3], 1 }
 0x933   :  { %1087 = vsyncpa [#allocation3 + $0x1], 1 }
 0x934   :  { %1088 = vsyncpa [#allocation6], 1 }
 0x935   :  { %1089 = vsyncpa [#allocation4], 1 }
 0x936   :  { %1091 = vsyncpa [#allocation4 + $0x1], 1 }

</bundles_post_ra>
